<compile_context>
chip_gen: v6e
topology: v6e:2x2x1
jax: 0.10.0
libtpu: 0.0.40
codegen_flags: <defaults>
</compile_context>

<pallas_src>
import jax
import jax.numpy as jnp
from jax.experimental import pallas as pl
from jax.experimental.pallas import tpu as pltpu

LANE = 128  # channel padding target (lane width)


# ----------------------------------------------------------------------------
# Pallas kernels
# ----------------------------------------------------------------------------
def _conv_kernel(x_ref, w_ref, s_ref, b_ref, o_ref):
    """One M-tile of an im2col conv: (TM, K) @ (K, Cp) -> folded BN -> ReLU -> (TM, Cp)."""
    acc = jnp.dot(x_ref[...], w_ref[...], preferred_element_type=jnp.float32)
    y = jnp.maximum(acc * s_ref[...] + b_ref[...], 0.0)
    o_ref[...] = y.astype(o_ref.dtype)


def _shift_down(v, axis):
    """v[i] -> v[i-1] along `axis`; index 0 filled with 0 (valid max-identity post-ReLU)."""
    lead = jax.lax.slice_in_dim(v, 0, 1, axis=axis)
    rest = jax.lax.slice_in_dim(v, 0, v.shape[axis] - 1, axis=axis)
    return jnp.concatenate([jnp.zeros_like(lead), rest], axis=axis)


def _conv1_pool_kernel(x_ref, w_ref, s_ref, b_ref, o_ref):
    """Fused layer0 for one image: im2col conv (7x7/s2) + BN + ReLU + MaxPool2d(3,s2,p1).

    x_ref : (1, P, K) bf16 im2col taps, rows ordered (h%2, w%2, h//2, w//2), P = Ho*Wo
    w_ref : (K, Cp)   bf16 weights (Cout zero-padded to Cp lanes)
    s/b   : (1, Cp)   folded BatchNorm (eval) scale / bias, f32
    o_ref : (1, Hp, Wp, Cp) pooled output (Hp = Ho//2, Wp = Wo//2)
    """
    hp, wp, cp = o_ref.shape[1], o_ref.shape[2], o_ref.shape[3]

    acc = jnp.dot(x_ref[0], w_ref[...], preferred_element_type=jnp.float32)  # (P, Cp)
    y = jnp.maximum(acc * s_ref[...] + b_ref[...], 0.0)                      # BN + ReLU

    # Parity-ordered rows: block q = 2*(h%2) + (w%2); within a block rows are (h//2, w//2).
    y = y.reshape(4, hp * wp, cp)
    y00 = y[0].reshape(hp, wp, cp)   # (h even, w even)
    y01 = y[1].reshape(hp, wp, cp)   # (h even, w odd )
    y10 = y[2].reshape(hp, wp, cp)   # (h odd , w even)
    y11 = y[3].reshape(hp, wp, cp)   # (h odd , w odd )

    # pool rows {2i-1, 2i, 2i+1}: even rows, odd rows, odd rows shifted by one pooled row
    r_even = jnp.maximum(jnp.maximum(y00, y10), _shift_down(y10, axis=0))    # w even cols
    r_odd = jnp.maximum(jnp.maximum(y01, y11), _shift_down(y11, axis=0))     # w odd  cols
    # pool cols {2j-1, 2j, 2j+1}
    pooled = jnp.maximum(jnp.maximum(r_even, r_odd), _shift_down(r_odd, axis=1))
    o_ref[0] = pooled.astype(o_ref.dtype)


# ----------------------------------------------------------------------------
# pallas_call wrappers
# ----------------------------------------------------------------------------
def _conv_pallas(x_im2col, w, scale, bias, out_dtype, tm):
    """x_im2col: (M, K) bf16; w: (K, Cp) bf16; scale/bias: (1, Cp) f32 -> (M, Cp)."""
    M, K = x_im2col.shape
    Cp = w.shape[1]
    assert M % tm == 0
    return pl.pallas_call(
        _conv_kernel,
        out_shape=jax.ShapeDtypeStruct((M, Cp), out_dtype),
        grid_spec=pltpu.PrefetchScalarGridSpec(
            num_scalar_prefetch=0,
            grid=(M // tm,),
            in_specs=[
                pl.BlockSpec((tm, K), lambda i: (i, 0)),
                pl.BlockSpec((K, Cp), lambda i: (0, 0)),   # weights stay VMEM resident
                pl.BlockSpec((1, Cp), lambda i: (0, 0)),
                pl.BlockSpec((1, Cp), lambda i: (0, 0)),
            ],
            out_specs=pl.BlockSpec((tm, Cp), lambda i: (i, 0)),
        ),
        compiler_params=pltpu.CompilerParams(dimension_semantics=("parallel",)),
    )(x_im2col, w, scale, bias)


def _conv1_pool_pallas(x_im2col, w, scale, bias, hp, wp, out_dtype):
    """x_im2col: (B, P, K) parity-ordered taps -> pooled (B, hp, wp, Cp)."""
    B, P, K = x_im2col.shape
    Cp = w.shape[1]
    return pl.pallas_call(
        _conv1_pool_kernel,
        out_shape=jax.ShapeDtypeStruct((B, hp, wp, Cp), out_dtype),
        grid_spec=pltpu.PrefetchScalarGridSpec(
            num_scalar_prefetch=0,
            grid=(B,),  # B >= 2 keeps both v7x TensorCores busy
            in_specs=[
                pl.BlockSpec((1, P, K), lambda b: (b, 0, 0)),
                pl.BlockSpec((K, Cp), lambda b: (0, 0)),
                pl.BlockSpec((1, Cp), lambda b: (0, 0)),
                pl.BlockSpec((1, Cp), lambda b: (0, 0)),
            ],
            out_specs=pl.BlockSpec((1, hp, wp, Cp), lambda b: (b, 0, 0, 0)),
        ),
        compiler_params=pltpu.CompilerParams(dimension_semantics=("parallel",)),
    )(x_im2col, w, scale, bias)


# ----------------------------------------------------------------------------
# Plain-JAX glue: im2col, parameter folding / padding, module wiring
# ----------------------------------------------------------------------------
def _im2col(x_nhwc, kh, kw, stride, pad):
    """(B,H,W,C) -> (B, Ho, Wo, kh*kw*C) taps (tap-major, channel-minor)."""
    B, H, W, C = x_nhwc.shape
    Ho = (H + 2 * pad - kh) // stride + 1
    Wo = (W + 2 * pad - kw) // stride + 1
    xp = jnp.pad(x_nhwc, ((0, 0), (pad, pad), (pad, pad), (0, 0)))
    cols = []
    for i in range(kh):
        for j in range(kw):
            cols.append(xp[:, i:i + stride * Ho:stride, j:j + stride * Wo:stride, :])
    return jnp.concatenate(cols, axis=-1), Ho, Wo


def _fold_bn(gamma, beta, rmean, rvar, eps=1e-5):
    scale = gamma / jnp.sqrt(rvar + eps)
    return scale, beta - rmean * scale


def _prep_weight(w_oihw, cin_pad, cout_pad):
    """(O,I,KH,KW) -> (KH*KW*cin_pad, cout_pad), zero padded, bf16."""
    O, I, KH, KW = w_oihw.shape
    w = jnp.transpose(w_oihw, (2, 3, 1, 0))                    # (KH, KW, I, O)
    w = jnp.pad(w, ((0, 0), (0, 0), (0, cin_pad - I), (0, cout_pad - O)))
    return w.reshape(KH * KW * cin_pad, cout_pad).astype(jnp.bfloat16)


def _prep_bn(bn, cout, cout_pad):
    s, b = _fold_bn(**bn)
    s = jnp.pad(s, (0, cout_pad - cout)).reshape(1, cout_pad).astype(jnp.float32)
    b = jnp.pad(b, (0, cout_pad - cout)).reshape(1, cout_pad).astype(jnp.float32)
    return s, b


def _pick_tile_m(m, cap=512):
    """Largest multiple-of-8 divisor of m <= cap, preferring >= 2 tiles (v7x megacore)."""
    limit = min(cap, m if m < 16 else m // 2)
    tm = 8 if m % 8 == 0 else m
    for c in range(8, limit + 1, 8):
        if m % c == 0:
            tm = c
    return tm


def _cout_pad(o):
    return max(LANE, ((o + LANE - 1) // LANE) * LANE)


def _layer0(x_nhwc, w_oihw, bn):
    """conv1(7x7,s2,p3,no bias) + bn1 + ReLU + MaxPool2d(3,s2,p1), one fused Pallas kernel."""
    O, I, KH, KW = w_oihw.shape
    B = x_nhwc.shape[0]
    taps, Ho, Wo = _im2col(x_nhwc, KH, KW, 2, 3)               # (B, Ho, Wo, KH*KW*Cin)
    assert Ho % 2 == 0 and Wo % 2 == 0
    hp, wp = Ho // 2, Wo // 2
    K = KH * KW * x_nhwc.shape[-1]
    # reorder rows to (h%2, w%2, h//2, w//2) so the fused stride-2 pool only needs shifts
    t = taps.reshape(B, hp, 2, wp, 2, K)                       # (B, a, s, b, t, K)
    t = jnp.transpose(t, (0, 2, 4, 1, 3, 5))                   # (B, s, t, a, b, K)
    x_flat = t.reshape(B, Ho * Wo, K).astype(jnp.bfloat16)
    cp = _cout_pad(O)
    w = _prep_weight(w_oihw, x_nhwc.shape[-1], cp)
    s, b = _prep_bn(bn, O, cp)
    return _conv1_pool_pallas(x_flat, w, s, b, hp, wp, jnp.bfloat16)   # (B, hp, wp, cp)


def _conv_bn_relu(x_nhwc, w_oihw, bn, stride, pad, out_dtype=jnp.bfloat16):
    """Conv2d(bias=False) + BatchNorm(eval) + ReLU as one im2col matmul Pallas kernel.

    x_nhwc carries channels padded to LANE; padded channels are zero and the matching
    weight Cin rows are zero, so results equal the unpadded conv.
    """
    B, H, W, cin_p = x_nhwc.shape
    O, I, KH, KW = w_oihw.shape
    taps, Ho, Wo = _im2col(x_nhwc, KH, KW, stride, pad)        # (B, Ho, Wo, KH*KW*cin_p)
    M = B * Ho * Wo                                            # batch merged into matmul M
    K = KH * KW * cin_p
    x_flat = taps.reshape(M, K).astype(jnp.bfloat16)
    cp = _cout_pad(O)
    w = _prep_weight(w_oihw, cin_p, cp)
    s, b = _prep_bn(bn, O, cp)
    y = _conv_pallas(x_flat, w, s, b, out_dtype, _pick_tile_m(M))
    return y.reshape(B, Ho, Wo, cp)


def bn_init(key, c):
    k1, k2, k3, k4 = jax.random.split(key, 4)
    return dict(
        gamma=1.0 + 0.1 * jax.random.normal(k1, (c,), jnp.float32),
        beta=0.1 * jax.random.normal(k2, (c,), jnp.float32),
        rmean=0.1 * jax.random.normal(k3, (c,), jnp.float32),
        rvar=0.5 + jax.random.uniform(k4, (c,), jnp.float32),
    )


def init_params(key):
    ks = jax.random.split(key, 8)
    he = lambda k, shape: (jnp.sqrt(2.0 / (shape[1] * shape[2] * shape[3]))
                           * jax.random.normal(k, shape, jnp.float32))
    return {
        # GeneralizedRCNNTransform normalization constants (ImageNet)
        "img_mean": jnp.array([0.485, 0.456, 0.406], jnp.float32),
        "img_std": jnp.array([0.229, 0.224, 0.225], jnp.float32),
        # layer0: conv1 (3->64, 7x7, s2, p3, no bias) + bn1
        "conv1_w": he(ks[0], (64, 3, 7, 7)),
        "bn1": bn_init(ks[1], 64),
        # layer1.encoder (representative bottleneck encoder)
        "enc1_w": he(ks[2], (64, 64, 3, 3)),
        "bn_enc1": bn_init(ks[3], 64),
        "enc2_w": he(ks[4], (16, 64, 3, 3)),
        "bn_enc2": bn_init(ks[5], 16),
    }


def rcnn_head_forward(params, images_nchw):
    """Forward of RcnnHead. images_nchw: (B, 3, H, W) float32 in [0, 1]."""
    B, C, H, W = images_nchw.shape
    original_image_sizes = [(H, W) for _ in range(B)]

    # --- self.transform: per-channel normalization + batching ---
    # TODO(synk): the transform's min/max-size bilinear resize is skipped (identity sizes).
    image_sizes = [(H, W) for _ in range(B)]
    batched_tensor_shape = (B, C, H, W)               # images.tensors.shape

    x = jnp.transpose(images_nchw, (0, 2, 3, 1))      # NCHW -> NHWC
    x = (x - params["img_mean"]) / params["img_std"]  # normalize BEFORE padding (bug fix)

    # --- self.layer0: conv1 + bn1 + relu + maxpool (single fused Pallas kernel) ---
    x = _layer0(x, params["conv1_w"], params["bn1"])                      # (B,16,16,128)

    # --- self.layer1_encoder (ext_classifier is None) ---
    x = _conv_bn_relu(x, params["enc1_w"], params["bn_enc1"], stride=2, pad=1)
    x = _conv_bn_relu(x, params["enc2_w"], params["bn_enc2"], stride=1, pad=1,
                      out_dtype=jnp.float32)

    # self.bottleneck_transformer is None: drop zero lane-padding, back to NCHW
    z = jnp.transpose(x[..., :params["enc2_w"].shape[0]], (0, 3, 1, 2))
    return z, batched_tensor_shape, image_sizes, original_image_sizes


# ----------------------------------------------------------------------------
# Pure-JAX f32 reference (numerical validation)
# ----------------------------------------------------------------------------
def reference_forward(params, images_nchw):
    mean = params["img_mean"].reshape(1, 3, 1, 1)
    std = params["img_std"].reshape(1, 3, 1, 1)
    x = (images_nchw - mean) / std

    def conv_bn_relu_ref(x, w, bn, stride, pad):
        y = jax.lax.conv_general_dilated(
            x, w, (stride, stride), [(pad, pad), (pad, pad)],
            dimension_numbers=("NCHW", "OIHW", "NCHW"))
        s, b = _fold_bn(**bn)
        return jnp.maximum(y * s.reshape(1, -1, 1, 1) + b.reshape(1, -1, 1, 1), 0.0)

    x = conv_bn_relu_ref(x, params["conv1_w"], params["bn1"], 2, 3)
    x = jax.lax.reduce_window(x, -jnp.inf, jax.lax.max, (1, 1, 3, 3), (1, 1, 2, 2),
                              [(0, 0), (0, 0), (1, 1), (1, 1)])
    x = conv_bn_relu_ref(x, params["enc1_w"], params["bn_enc1"], 2, 1)
    x = conv_bn_relu_ref(x, params["enc2_w"], params["bn_enc2"], 1, 1)
    return x


# ----------------------------------------------------------------------------
if __name__ == "__main__":
    key = jax.random.PRNGKey(0)
    kp, kx = jax.random.split(key)
    params = init_params(kp)

    # small deterministic inputs: batch of 2 RGB images 64x64 in [0, 1]
    images = jax.random.uniform(kx, (2, 3, 64, 64), jnp.float32)

    z, batched_shape, image_sizes, orig_sizes = rcnn_head_forward(params, images)
    z = jax.block_until_ready(z)

    z_ref = jax.block_until_ready(reference_forward(params, images))
    assert z.shape == z_ref.shape == (2, 16, 8, 8), (z.shape, z_ref.shape)
    assert batched_shape == (2, 3, 64, 64)
    assert image_sizes == [(64, 64), (64, 64)] and orig_sizes == [(64, 64), (64, 64)]

    max_err = float(jnp.max(jnp.abs(z - z_ref)))
    ref_scale = float(jnp.max(jnp.abs(z_ref)))
    # bf16 matmul operands / bf16 inter-layer activations -> compare with a relative bound
    assert max_err <= 0.05 * ref_scale + 1e-3, (max_err, ref_scale)

    print("KERNEL_OK")
</pallas_src>

<mosaic_0001>
module attributes {stable_mosaic.version = 11 : i64} {
  func.func @_conv1_pool_kernel(%arg0: i32, %arg1: memref<1x1024x147xbf16, #tpu.memory_space<vmem>>, %arg2: memref<147x128xbf16, #tpu.memory_space<vmem>>, %arg3: memref<1x128xf32, #tpu.memory_space<vmem>>, %arg4: memref<1x128xf32, #tpu.memory_space<vmem>>, %arg5: memref<1x16x16x128xbf16, #tpu.memory_space<vmem>>) attributes {dimension_semantics = [#tpu.dimension_semantics<parallel>], iteration_bounds = array<i64: 2>, scalar_prefetch = 0 : i64, scratch_operands = 0 : i64, tpu.core_type = #tpu.core_type<tc>, window_params = [{transform_indices = @transform_0, window_bounds = array<i64: 1, 1024, 147>}, {pipeline_mode = #tpu.pipeline_mode<synchronous>, transform_indices = @transform_1, window_bounds = array<i64: 147, 128>}, {pipeline_mode = #tpu.pipeline_mode<synchronous>, transform_indices = @transform_2, window_bounds = array<i64: 1, 128>}, {pipeline_mode = #tpu.pipeline_mode<synchronous>, transform_indices = @transform_3, window_bounds = array<i64: 1, 128>}, {transform_indices = @transform_4, window_bounds = array<i64: 1, 16, 16, 128>}]} {
    %c0 = arith.constant 0 : index
    %c0_0 = arith.constant 0 : index
    %c0_1 = arith.constant 0 : index
    %0 = vector.load %arg1[%c0, %c0_0, %c0_1] : memref<1x1024x147xbf16, #tpu.memory_space<vmem>>, vector<1x1024x147xbf16>
    %1 = vector.shape_cast %0 : vector<1x1024x147xbf16> to vector<1024x147xbf16>
    %c0_2 = arith.constant 0 : index
    %c0_3 = arith.constant 0 : index
    %2 = vector.load %arg2[%c0_2, %c0_3] : memref<147x128xbf16, #tpu.memory_space<vmem>>, vector<147x128xbf16>
    %cst = arith.constant dense<0.000000e+00> : vector<1024x128xf32>
    %3 = tpu.matmul %1, %2, %cst {dimension_numbers = #tpu.dot_dimension_numbers<[1], [0], [0], [1], [0, 0, 1, 1], [], []>} : vector<1024x147xbf16>, vector<147x128xbf16>, vector<1024x128xf32> -> vector<1024x128xf32>
    %c0_4 = arith.constant 0 : index
    %c0_5 = arith.constant 0 : index
    %4 = vector.load %arg3[%c0_4, %c0_5] : memref<1x128xf32, #tpu.memory_space<vmem>>, vector<1x128xf32>
    %5 = vector.broadcast %4 : vector<1x128xf32> to vector<1024x128xf32>
    %6 = arith.mulf %3, %5 : vector<1024x128xf32>
    %c0_6 = arith.constant 0 : index
    %c0_7 = arith.constant 0 : index
    %7 = vector.load %arg4[%c0_6, %c0_7] : memref<1x128xf32, #tpu.memory_space<vmem>>, vector<1x128xf32>
    %8 = vector.broadcast %7 : vector<1x128xf32> to vector<1024x128xf32>
    %9 = arith.addf %6, %8 : vector<1024x128xf32>
    %cst_8 = arith.constant 0.000000e+00 : f32
    %10 = vector.broadcast %cst_8 : f32 to vector<1024x128xf32>
    %11 = arith.maximumf %9, %10 : vector<1024x128xf32>
    %12 = vector.shape_cast %11 : vector<1024x128xf32> to vector<4x256x128xf32>
    %13 = vector.extract_strided_slice %12 {offsets = [0, 0, 0], sizes = [1, 256, 128], strides = [1, 1, 1]} : vector<4x256x128xf32> to vector<1x256x128xf32>
    %14 = vector.shape_cast %13 : vector<1x256x128xf32> to vector<256x128xf32>
    %15 = vector.shape_cast %14 : vector<256x128xf32> to vector<16x16x128xf32>
    %16 = vector.extract_strided_slice %12 {offsets = [1, 0, 0], sizes = [1, 256, 128], strides = [1, 1, 1]} : vector<4x256x128xf32> to vector<1x256x128xf32>
    %17 = vector.shape_cast %16 : vector<1x256x128xf32> to vector<256x128xf32>
    %18 = vector.shape_cast %17 : vector<256x128xf32> to vector<16x16x128xf32>
    %19 = vector.extract_strided_slice %12 {offsets = [2, 0, 0], sizes = [1, 256, 128], strides = [1, 1, 1]} : vector<4x256x128xf32> to vector<1x256x128xf32>
    %20 = vector.shape_cast %19 : vector<1x256x128xf32> to vector<256x128xf32>
    %21 = vector.shape_cast %20 : vector<256x128xf32> to vector<16x16x128xf32>
    %22 = vector.extract_strided_slice %12 {offsets = [3, 0, 0], sizes = [1, 256, 128], strides = [1, 1, 1]} : vector<4x256x128xf32> to vector<1x256x128xf32>
    %23 = vector.shape_cast %22 : vector<1x256x128xf32> to vector<256x128xf32>
    %24 = vector.shape_cast %23 : vector<256x128xf32> to vector<16x16x128xf32>
    %25 = arith.maximumf %15, %21 : vector<16x16x128xf32>
    %26 = vector.extract_strided_slice %21 {offsets = [0, 0, 0], sizes = [15, 16, 128], strides = [1, 1, 1]} : vector<16x16x128xf32> to vector<15x16x128xf32>
    %cst_9 = arith.constant 0.000000e+00 : f32
    %27 = vector.broadcast %cst_9 : f32 to vector<1x16x128xf32>
    %28 = tpu.concatenate %27, %26 in 0 : vector<1x16x128xf32>, vector<15x16x128xf32> -> vector<16x16x128xf32>
    %29 = arith.maximumf %25, %28 : vector<16x16x128xf32>
    %30 = arith.maximumf %18, %24 : vector<16x16x128xf32>
    %31 = vector.extract_strided_slice %24 {offsets = [0, 0, 0], sizes = [15, 16, 128], strides = [1, 1, 1]} : vector<16x16x128xf32> to vector<15x16x128xf32>
    %cst_10 = arith.constant 0.000000e+00 : f32
    %32 = vector.broadcast %cst_10 : f32 to vector<1x16x128xf32>
    %33 = tpu.concatenate %32, %31 in 0 : vector<1x16x128xf32>, vector<15x16x128xf32> -> vector<16x16x128xf32>
    %34 = arith.maximumf %30, %33 : vector<16x16x128xf32>
    %35 = arith.maximumf %29, %34 : vector<16x16x128xf32>
    %36 = vector.extract_strided_slice %34 {offsets = [0, 0, 0], sizes = [16, 15, 128], strides = [1, 1, 1]} : vector<16x16x128xf32> to vector<16x15x128xf32>
    %cst_11 = arith.constant 0.000000e+00 : f32
    %37 = vector.broadcast %cst_11 : f32 to vector<16x1x128xf32>
    %38 = tpu.concatenate %37, %36 in 1 : vector<16x1x128xf32>, vector<16x15x128xf32> -> vector<16x16x128xf32>
    %39 = arith.maximumf %35, %38 : vector<16x16x128xf32>
    %40 = arith.truncf %39 : vector<16x16x128xf32> to vector<16x16x128xbf16>
    %c0_12 = arith.constant 0 : index
    %c0_13 = arith.constant 0 : index
    %c0_14 = arith.constant 0 : index
    %c0_15 = arith.constant 0 : index
    %41 = vector.load %arg5[%c0_12, %c0_13, %c0_14, %c0_15] : memref<1x16x16x128xbf16, #tpu.memory_space<vmem>>, vector<1x16x16x128xbf16>
    %42 = vector.shape_cast %41 : vector<1x16x16x128xbf16> to vector<16x16x128xbf16>
    %43 = vector.shape_cast %40 : vector<16x16x128xbf16> to vector<1x16x16x128xbf16>
    tpu.vector_store %arg5[%c0_12, %c0_13, %c0_14, %c0_15], %43 {strides = array<i32>} : memref<1x16x16x128xbf16, #tpu.memory_space<vmem>>, vector<1x16x16x128xbf16>,
    return
  }
  func.func @transform_0(%arg0: i32) -> (i32, i32, i32) {
    %c0_i32 = arith.constant 0 : i32
    %c0_i32_0 = arith.constant 0 : i32
    %c0_i32_1 = arith.constant 0 : i32
    return %arg0, %c0_i32, %c0_i32_0 : i32, i32, i32
  }
  func.func @transform_1(%arg0: i32) -> (i32, i32) {
    %c0_i32 = arith.constant 0 : i32
    %c0_i32_0 = arith.constant 0 : i32
    %c0_i32_1 = arith.constant 0 : i32
    return %c0_i32, %c0_i32_0 : i32, i32
  }
  func.func @transform_2(%arg0: i32) -> (i32, i32) {
    %c0_i32 = arith.constant 0 : i32
    %c0_i32_0 = arith.constant 0 : i32
    %c0_i32_1 = arith.constant 0 : i32
    return %c0_i32, %c0_i32_0 : i32, i32
  }
  func.func @transform_3(%arg0: i32) -> (i32, i32) {
    %c0_i32 = arith.constant 0 : i32
    %c0_i32_0 = arith.constant 0 : i32
    %c0_i32_1 = arith.constant 0 : i32
    return %c0_i32, %c0_i32_0 : i32, i32
  }
  func.func @transform_4(%arg0: i32) -> (i32, i32, i32, i32) {
    %c0_i32 = arith.constant 0 : i32
    %c0_i32_0 = arith.constant 0 : i32
    %c0_i32_1 = arith.constant 0 : i32
    %c0_i32_2 = arith.constant 0 : i32
    return %arg0, %c0_i32, %c0_i32_0, %c0_i32_1 : i32, i32, i32, i32
  }
}

</mosaic_0001>

<bundles_post_ra>
// kernel: tpu_custom_call.1
= control target key start
LH: loop header
LB: loop body
LE: loop exit
PB: predicated region body
PF: predicated region fallthrough
CT: control target
= control target key end

     0   :  { %9 = vsyncpa [#allocation3], 0  ;;  %s4169_s0 = inlined_call_operand.vmem [shape: bf16[2,1024,147], index: 0, kind: input, shape index: {}]   ;;  %s4170_s1 = inlined_call_operand.vmem [shape: bf16[147,128], index: 1, kind: input, shape index: {}]   ;;  %s4171_s2 = inlined_call_operand.vmem [shape: f32[1,128], index: 2, kind: input, shape index: {}]   ;;  %s4172_s3 = inlined_call_operand.vmem [shape: f32[1,128], index: 3, kind: input, shape index: {}]   ;;  %s4173_s4 = inlined_call_operand.hbm [shape: bf16[2,16,16,128], index: 4, kind: output, shape index: {}]  }
   0x1   :  { %11 = vsyncpa [#allocation3 + $0x1], 0  ;;  %s3412_s15 = smov 0   ;;  %s3414_s16 = smov 0  }
   0x2   :  { %s3416_s17 = smov 0   ;;  %s3418_s18 = smov 0  }
   0x3 LB: > { %s3433_s19 = sadd.s32 4294967295, %s3380_s18   ;;  %s2676_s20 = sadd.s32 4294967294, %s3380_s18   ;;  %s3380_s18 = sphi %s3418_s18, %s4179_s18   ;;  %s3376_s17 = sphi %s3416_s17, %s4178_s17   ;;  %s3372_s16 = sphi %s3414_s16, %s4177_s16   ;;  %s3368_s15 = sphi %s3412_s15, %s4176_s15  }
   0x4   : > { %s3437_s21 = sadd.s32 1, %s3380_s18   ;;  %s113_s22 = sadd.s32 1, %s3376_s17 }
   0x5   : > { %s110_s23 = ssub.s32 %s3380_s18, %s3437_s21  ;;  %p123_p0 = scmp.ne.s32.totalorder %s3376_s17, %s3372_s16 }
   0x6   : > { %p111_p1 = scmp.eq.s32.totalorder %s110_s23, 0  ;;  %p124_p2 = scmp.eq.s32.totalorder %s3433_s19, 1 }
   0x7   : > { %p129_p3 = scmp.ne.s32.totalorder %s3372_s16, %s3368_s15  ;;  %p130_p4 = scmp.eq.s32.totalorder %s2676_s20, 1 }
   0x8   : > { %s3448_s24 = scalar_select %p111_p1, %s3376_s17, %s113_s22  }
   0x9   : > { %p3450_p5 = por %p124_p2, %p123_p0  ;;  %p3454_p6 = por %p130_p4, %p129_p3 }
   0xa   : > { %p2679_p7 = scmp.ge.s32.totalorder %s3380_s18, 1  ;;  %p165_p8 = scmp.lt.s32.totalorder %s3380_s18, 3 }
   0xc   : > { %p166_p9 = pnand %p2679_p7, %p165_p8 }
   0xd   : > { %p191_p10 = scmp.lt.s32.totalorder (!%p166_p9), %s3433_s19, 1  ;;  %s2957_s29 = sshll.u32 (!%p166_p9), %s3433_s19, 11 }
   0xe   : > { %169 = sbr.rel (%p166_p9) target bundleno = 537 (0x219), region = 36  ;;  %s3384_s9 = smov (!%p166_p9), [#allocation2]  }
  0x13   : > { %v3116_v0 = vld [vmem:[%s4170_s1 + $0x38] sm:$0xff]   ;;  %v3382_v1 = vmov 0   ;;  %v3117_v2 = vld [vmem:[%s4170_s1 + $0x30] sm:$0xff]   ;;  %v3118_v3 = vld [vmem:[%s4170_s1 + $0x28] sm:$0xff]   ;;  %s192_s7 = scalar_select %p191_p10, %s3433_s19, 1  ;;  %vm977_vm0 = vcmask 154624  }
  0x14   : > { %1177 = vmatprep.subr.bf16.mxu0 %v3382_v1  ;;  %3053 = vmatprep.subr.bf16.mxu1 %v3382_v1  ;;  %v3119_v4 = vld [vmem:[%s4170_s1 + $0x20] sm:$0xff]   ;;  %v3120_v5 = vld [vmem:[%s4170_s1 + $0x18] sm:$0xff]   ;;  %v3121_v8 = vld [vmem:[%s4170_s1 + $0x10] sm:$0xff]   ;;  %vm1170_vm1 = vcmask 1040384   ;;  %vm1171_vm2 = vcmask 1041408   ;;  %v3383_v10 = vmov 65535  }
  0x15   : > { %1178 = vmatpush1.bf16.msra.mxu0 %v3116_v0  ;;  %3063 = vmatpush1.bf16.msra.mxu1 %v3116_v0  ;;  %s2924_s10 = sshll.u32 %s192_s7, 10  ;;  %v3122_v9 = vld [vmem:[%s4170_s1 + $0x8] sm:$0xff]   ;;  %v1172_v11 = vsel %vm1170_vm1, 4294967295, %v3383_v10  ;;  %v3123_v12 = vld [vmem:[%s4170_s1] sm:$0xff]   ;;  %s4122_s7 = scalar_lea.hbm %s4173_s4, %s2957_s29 }
  0x16   : > { %1179 = vmatprep.subr.bf16.mxu0 %v3382_v1  ;;  %3054 = vmatprep.subr.bf16.mxu1 %v3382_v1  ;;  %s3477_s13 = scalar_lea.vmem %s4169_s0, %s2924_s10  ;;  %v3124_v13 = vld [vmem:[%s4170_s1 + $0x48] ss:$0 sps:$4 sm:$0x33]   ;;  %v1173_v14 = vsel %vm1171_vm2, %v1172_v11, 0  ;;  %v3125_v16 = vld [vmem:[%s4170_s1 + $0x40] sm:$0xff]   ;;  %s3324_s10 = sshll.u32 %s3384_s9, 4  ;;  %s3325_s10 = int_to_ptr.vmem [resolvable:$false] %s3324_s10 }
  0x17   : > { %v3128_v6 = vld [vmem:[%s3477_s13 + $0x4] ss:$8 sps:$4 sm:$0xff]   ;;  %v1175_v15 = vand.u32 %v3124_v13, %v1173_v14  ;;  %v3126_v17 = vld [vmem:[%s3477_s13] ss:$8 sps:$4 sm:$0xff]   ;;  %v3132_v19 = vld [vmem:[%s3477_s13 + $0x14] ss:$8 sps:$4 sm:$0xff]  }
  0x18   : > { %v3131_v7 = vld [vmem:[%s3477_s13 + $0x204] ss:$8 sps:$4 sm:$0xff]   ;;  %2821 = vmatprep.mubr.msk.bf16.mxu0 %vm977_vm0, %v3128_v6  ;;  %v3129_v18 = vld [vmem:[%s3477_s13 + $0x200] ss:$8 sps:$4 sm:$0xff]   ;;  %v3134_v20 = vld [vmem:[%s3477_s13 + $0x214] ss:$8 sps:$4 sm:$0xff]  }
  0x19   : > { %1180 = vmatpush1.bf16.msra.mxu0 %v3117_v2  ;;  %3064 = vmatpush1.bf16.msra.mxu1 %v3117_v2  ;;  %v3136_v21 = vld [vmem:[%s3477_s13 + $0x10] ss:$8 sps:$4 sm:$0xff]   ;;  %v3138_v23 = vld [vmem:[%s3477_s13 + $0x24] ss:$8 sps:$4 sm:$0xff]   ;;  %v3142_v25 = vld [vmem:[%s3477_s13 + $0x20] ss:$8 sps:$4 sm:$0xff]  }
  0x1a   : > { %1181 = vmatprep.subr.bf16.mxu0 %v3382_v1  ;;  %3055 = vmatprep.subr.bf16.mxu1 %v3382_v1  ;;  %v3137_v22 = vld [vmem:[%s3477_s13 + $0x210] ss:$8 sps:$4 sm:$0xff]   ;;  %v3140_v24 = vld [vmem:[%s3477_s13 + $0x224] ss:$8 sps:$4 sm:$0xff]   ;;  %v3143_v26 = vld [vmem:[%s3477_s13 + $0x220] ss:$8 sps:$4 sm:$0xff]  }
  0x1b   : > { %2853 = vmatprep.mubr.msk.bf16.mxu1 %vm977_vm0, %v3131_v7  ;;  %v3144_v27 = vld [vmem:[%s3477_s13 + $0x34] ss:$8 sps:$4 sm:$0xff]   ;;  %v3148_v29 = vld [vmem:[%s3477_s13 + $0x30] ss:$8 sps:$4 sm:$0xff]   ;;  %v3150_v31 = vld [vmem:[%s3477_s13 + $0x44] ss:$8 sps:$4 sm:$0xff]  }
  0x1c   : > { %v3146_v28 = vld [vmem:[%s3477_s13 + $0x234] ss:$8 sps:$4 sm:$0xff]   ;;  %v3149_v30 = vld [vmem:[%s3477_s13 + $0x230] ss:$8 sps:$4 sm:$0xff]   ;;  %v3152_v32 = vld [vmem:[%s3477_s13 + $0x244] ss:$8 sps:$4 sm:$0xff]  }
  0x1d   : > { %1182 = vmatpush1.bf16.msra.mxu0 %v3118_v3  ;;  %3065 = vmatpush1.bf16.msra.mxu1 %v3118_v3  ;;  %v3154_v33 = vld [vmem:[%s3477_s13 + $0x40] ss:$8 sps:$4 sm:$0xff]   ;;  %v3156_v35 = vld [vmem:[%s3477_s13 + $0x54] ss:$8 sps:$4 sm:$0xff]   ;;  %v3160_v37 = vld [vmem:[%s3477_s13 + $0x50] ss:$8 sps:$4 sm:$0xff]  }
  0x1e   : > { %1183 = vmatprep.subr.bf16.mxu0 %v3382_v1  ;;  %3056 = vmatprep.subr.bf16.mxu1 %v3382_v1  ;;  %v3155_v34 = vld [vmem:[%s3477_s13 + $0x240] ss:$8 sps:$4 sm:$0xff]   ;;  %v3158_v36 = vld [vmem:[%s3477_s13 + $0x254] ss:$8 sps:$4 sm:$0xff]   ;;  %v3161_v38 = vld [vmem:[%s3477_s13 + $0x250] ss:$8 sps:$4 sm:$0xff]  }
  0x1f   : > { %v3162_v39 = vld [vmem:[%s3477_s13 + $0x64] ss:$8 sps:$4 sm:$0xff]   ;;  %v3166_v41 = vld [vmem:[%s3477_s13 + $0x60] ss:$8 sps:$4 sm:$0xff]   ;;  %v3168_v43 = vld [vmem:[%s3477_s13 + $0x74] ss:$8 sps:$4 sm:$0xff]  }
  0x20   : > { %v3164_v40 = vld [vmem:[%s3477_s13 + $0x264] ss:$8 sps:$4 sm:$0xff]   ;;  %v3167_v42 = vld [vmem:[%s3477_s13 + $0x260] ss:$8 sps:$4 sm:$0xff]   ;;  %v3170_v44 = vld [vmem:[%s3477_s13 + $0x274] ss:$8 sps:$4 sm:$0xff]  }
  0x21   : > { %1184 = vmatpush1.bf16.msra.mxu0 %v3119_v4  ;;  %3066 = vmatpush1.bf16.msra.mxu1 %v3119_v4  ;;  %v3172_v45 = vld [vmem:[%s3477_s13 + $0x70] ss:$8 sps:$4 sm:$0xff]   ;;  %v3174_v47 = vld [vmem:[%s3477_s13 + $0x84] ss:$8 sps:$4 sm:$0xff]   ;;  %v3178_v49 = vld [vmem:[%s3477_s13 + $0x80] ss:$8 sps:$4 sm:$0xff]  }
  0x22   : > { %1185 = vmatprep.subr.bf16.mxu0 %v3382_v1  ;;  %3057 = vmatprep.subr.bf16.mxu1 %v3382_v1  ;;  %v3173_v46 = vld [vmem:[%s3477_s13 + $0x270] ss:$8 sps:$4 sm:$0xff]   ;;  %v3176_v48 = vld [vmem:[%s3477_s13 + $0x284] ss:$8 sps:$4 sm:$0xff]   ;;  %v3179_v50 = vld [vmem:[%s3477_s13 + $0x280] ss:$8 sps:$4 sm:$0xff]  }
  0x23   : > { %v3180_v51 = vld [vmem:[%s3477_s13 + $0x94] ss:$8 sps:$4 sm:$0xff]   ;;  %v3184_v53 = vld [vmem:[%s3477_s13 + $0x90] ss:$8 sps:$4 sm:$0xff]   ;;  %v3186_v55 = vld [vmem:[%s3477_s13 + $0xa4] ss:$8 sps:$4 sm:$0xff]  }
  0x24   : > { %v3182_v52 = vld [vmem:[%s3477_s13 + $0x294] ss:$8 sps:$4 sm:$0xff]   ;;  %v3185_v54 = vld [vmem:[%s3477_s13 + $0x290] ss:$8 sps:$4 sm:$0xff]   ;;  %v3188_v56 = vld [vmem:[%s3477_s13 + $0x2a4] ss:$8 sps:$4 sm:$0xff]  }
  0x25   : > { %1186 = vmatpush1.bf16.msra.mxu0 %v3120_v5  ;;  %3067 = vmatpush1.bf16.msra.mxu1 %v3120_v5  ;;  %v3190_v57 = vld [vmem:[%s3477_s13 + $0xa0] ss:$8 sps:$4 sm:$0xff]   ;;  %v3192_v59 = vld [vmem:[%s3477_s13 + $0xb4] ss:$8 sps:$4 sm:$0xff]   ;;  %v3196_v61 = vld [vmem:[%s3477_s13 + $0xb0] ss:$8 sps:$4 sm:$0xff]  }
  0x26   : > { %1187 = vmatprep.subr.bf16.mxu0 %v3382_v1  ;;  %3058 = vmatprep.subr.bf16.mxu1 %v3382_v1  ;;  %v3191_v58 = vld [vmem:[%s3477_s13 + $0x2a0] ss:$8 sps:$4 sm:$0xff]   ;;  %v3194_v60 = vld [vmem:[%s3477_s13 + $0x2b4] ss:$8 sps:$4 sm:$0xff]   ;;  %v3197_v62 = vld [vmem:[%s3477_s13 + $0x2b0] ss:$8 sps:$4 sm:$0xff]  }
  0x27   : > { %v3198_v63 = vld [vmem:[%s3477_s13 + $0xc4] ss:$8 sps:$4 sm:$0xff]   ;;  %v3203_v2 = vld [vmem:[%s3477_s13 + $0x2c0] ss:$8 sps:$4 sm:$0xff]   ;;  %v3204_v3 = vld [vmem:[%s3477_s13 + $0xd4] ss:$8 sps:$4 sm:$0xff]  }
  0x28   : > { %v3200_v0 = vld [vmem:[%s3477_s13 + $0x2c4] ss:$8 sps:$4 sm:$0xff]   ;;  %v3206_v4 = vld [vmem:[%s3477_s13 + $0x2d4] ss:$8 sps:$4 sm:$0xff]   ;;  %v3208_v5 = vld [vmem:[%s3477_s13 + $0xd0] ss:$8 sps:$4 sm:$0xff]  }
  0x29   : > { %1188 = vmatpush1.bf16.msra.mxu0 %v3121_v8  ;;  %3068 = vmatpush1.bf16.msra.mxu1 %v3121_v8  ;;  %v3209_v6 = vld [vmem:[%s3477_s13 + $0x2d0] ss:$8 sps:$4 sm:$0xff]   ;;  %v3210_v7 = vld [vmem:[%s3477_s13 + $0xe4] ss:$8 sps:$4 sm:$0xff]   ;;  %v3215_v10 = vld [vmem:[%s3477_s13 + $0x2e0] ss:$8 sps:$4 sm:$0xff]  }
  0x2a   : > { %1189 = vmatprep.subr.bf16.mxu0 %v3382_v1  ;;  %3059 = vmatprep.subr.bf16.mxu1 %v3382_v1  ;;  %v3212_v8 = vld [vmem:[%s3477_s13 + $0x2e4] ss:$8 sps:$4 sm:$0xff]   ;;  %v3216_v11 = vld [vmem:[%s3477_s13 + $0xf4] ss:$8 sps:$4 sm:$0xff]   ;;  %v3220_v13 = vld [vmem:[%s3477_s13 + $0xf0] ss:$8 sps:$4 sm:$0xff]  }
  0x2b   : > { %v3221_v14 = vld [vmem:[%s3477_s13 + $0x2f0] ss:$8 sps:$4 sm:$0xff]   ;;  %s3326_s11 = scalar_lea.vmem %s3325_s10, 4096 }
  0x2d   : > { %1190 = vmatpush1.bf16.msra.mxu0 %v3122_v9  ;;  %3069 = vmatpush1.bf16.msra.mxu1 %v3122_v9  ;;  %v3214_v9 = vld [vmem:[%s3477_s13 + $0xe0] ss:$8 sps:$4 sm:$0xff]  }
  0x2e   : > { %1191 = vmatprep.subr.bf16.mxu0 %v3382_v1  ;;  %3060 = vmatprep.subr.bf16.mxu1 %v3382_v1 }
  0x31   : > { %1192 = vmatpush1.bf16.msra.mxu0 %v3123_v12  ;;  %3070 = vmatpush1.bf16.msra.mxu1 %v3123_v12  ;;  %v3218_v12 = vld [vmem:[%s3477_s13 + $0x2f4] ss:$8 sps:$4 sm:$0xff]  }
  0x32   : > { %1205 = vmatprep.subr.bf16.mxu0 %v3382_v1  ;;  %3061 = vmatprep.subr.bf16.mxu1 %v3382_v1 }
  0x35   : > { %1206 = vmatpush2.bf16.msra.mxu0 %v1175_v15  ;;  %3071 = vmatpush2.bf16.msra.mxu1 %v1175_v15  ;;  %v3222_v15 = vld [vmem:[%s3477_s13 + $0x104] ss:$8 sps:$4 sm:$0xff]  }
  0x36   : > { %1207 = vmatprep.subr.bf16.mxu0 %v3382_v1  ;;  %3062 = vmatprep.subr.bf16.mxu1 %v3382_v1  ;;  %v3202_v1 = vld [vmem:[%s3477_s13 + $0xc0] ss:$8 sps:$4 sm:$0xff]  }
  0x39   : > { %1208 = vmatpush2.bf16.msra.mxu0 %v3125_v16  ;;  %3072 = vmatpush2.bf16.msra.mxu1 %v3125_v16  ;;  %v3224_v16 = vld [vmem:[%s3477_s13 + $0x304] ss:$8 sps:$4 sm:$0xff]  }
  0x3c   : > { %1210 = vmatmul.mubr.bf16.vlgmr.msra.gmra.mxu0 %v3126_v17  ;;  %1466 = vmatmul.mubr.bf16.vlgmr.msra.gmra.mxu1 %v3129_v18  ;;  %v3226_v17 = vld [vmem:[%s3477_s13 + $0x100] ss:$8 sps:$4 sm:$0xff]  }
  0x3d   : > { %2822 = vmatprep.mubr.msk.bf16.mxu0 %vm977_vm0, %v3132_v19  ;;  %2854 = vmatprep.mubr.msk.bf16.mxu1 %vm977_vm0, %v3134_v20  ;;  %v3227_v18 = vld [vmem:[%s3477_s13 + $0x300] ss:$8 sps:$4 sm:$0xff]   ;;  %v3228_v19 = vld [vmem:[%s3477_s13 + $0x114] ss:$8 sps:$4 sm:$0xff]  }
  0x3e   : > { %v3230_v20 = vld [vmem:[%s3477_s13 + $0x314] ss:$8 sps:$4 sm:$0xff]  }
  0x44   : > { %1218 = vmatmul.mubr.bf16.gmra.mxu0 %v3136_v21  ;;  %1474 = vmatmul.mubr.bf16.gmra.mxu1 %v3137_v22  ;;  %v3232_v21 = vld [vmem:[%s3477_s13 + $0x110] ss:$8 sps:$4 sm:$0xff]  }
  0x45   : > { %2823 = vmatprep.mubr.msk.bf16.mxu0 %vm977_vm0, %v3138_v23  ;;  %2855 = vmatprep.mubr.msk.bf16.mxu1 %vm977_vm0, %v3140_v24  ;;  %v3233_v22 = vld [vmem:[%s3477_s13 + $0x310] ss:$8 sps:$4 sm:$0xff]   ;;  %v3234_v23 = vld [vmem:[%s3477_s13 + $0x124] ss:$8 sps:$4 sm:$0xff]  }
  0x46   : > { %v3236_v24 = vld [vmem:[%s3477_s13 + $0x324] ss:$8 sps:$4 sm:$0xff]  }
  0x4c   : > { %1226 = vmatmul.mubr.bf16.gmra.mxu0 %v3142_v25  ;;  %1482 = vmatmul.mubr.bf16.gmra.mxu1 %v3143_v26  ;;  %v3238_v25 = vld [vmem:[%s3477_s13 + $0x120] ss:$8 sps:$4 sm:$0xff]  }
  0x4d   : > { %2824 = vmatprep.mubr.msk.bf16.mxu0 %vm977_vm0, %v3144_v27  ;;  %2856 = vmatprep.mubr.msk.bf16.mxu1 %vm977_vm0, %v3146_v28  ;;  %v3239_v26 = vld [vmem:[%s3477_s13 + $0x320] ss:$8 sps:$4 sm:$0xff]   ;;  %v3240_v27 = vld [vmem:[%s3477_s13 + $0x134] ss:$8 sps:$4 sm:$0xff]  }
  0x4e   : > { %v3242_v28 = vld [vmem:[%s3477_s13 + $0x334] ss:$8 sps:$4 sm:$0xff]  }
  0x54   : > { %1234 = vmatmul.mubr.bf16.gmra.mxu0 %v3148_v29  ;;  %1490 = vmatmul.mubr.bf16.gmra.mxu1 %v3149_v30  ;;  %v3244_v29 = vld [vmem:[%s3477_s13 + $0x130] ss:$8 sps:$4 sm:$0xff]  }
  0x55   : > { %2825 = vmatprep.mubr.msk.bf16.mxu0 %vm977_vm0, %v3150_v31  ;;  %2857 = vmatprep.mubr.msk.bf16.mxu1 %vm977_vm0, %v3152_v32  ;;  %v3245_v30 = vld [vmem:[%s3477_s13 + $0x330] ss:$8 sps:$4 sm:$0xff]   ;;  %v3246_v31 = vld [vmem:[%s3477_s13 + $0x144] ss:$8 sps:$4 sm:$0xff]  }
  0x56   : > { %v3248_v32 = vld [vmem:[%s3477_s13 + $0x344] ss:$8 sps:$4 sm:$0xff]  }
  0x5c   : > { %1242 = vmatmul.mubr.bf16.gmra.mxu0 %v3154_v33  ;;  %1498 = vmatmul.mubr.bf16.gmra.mxu1 %v3155_v34  ;;  %v3250_v33 = vld [vmem:[%s3477_s13 + $0x140] ss:$8 sps:$4 sm:$0xff]  }
  0x5d   : > { %2826 = vmatprep.mubr.msk.bf16.mxu0 %vm977_vm0, %v3156_v35  ;;  %2858 = vmatprep.mubr.msk.bf16.mxu1 %vm977_vm0, %v3158_v36  ;;  %v3251_v34 = vld [vmem:[%s3477_s13 + $0x340] ss:$8 sps:$4 sm:$0xff]   ;;  %v3252_v35 = vld [vmem:[%s3477_s13 + $0x154] ss:$8 sps:$4 sm:$0xff]  }
  0x5e   : > { %v3254_v36 = vld [vmem:[%s3477_s13 + $0x354] ss:$8 sps:$4 sm:$0xff]  }
  0x64   : > { %1250 = vmatmul.mubr.bf16.gmra.mxu0 %v3160_v37  ;;  %1506 = vmatmul.mubr.bf16.gmra.mxu1 %v3161_v38  ;;  %v3256_v37 = vld [vmem:[%s3477_s13 + $0x150] ss:$8 sps:$4 sm:$0xff]  }
  0x65   : > { %2827 = vmatprep.mubr.msk.bf16.mxu0 %vm977_vm0, %v3162_v39  ;;  %2859 = vmatprep.mubr.msk.bf16.mxu1 %vm977_vm0, %v3164_v40  ;;  %v3257_v38 = vld [vmem:[%s3477_s13 + $0x350] ss:$8 sps:$4 sm:$0xff]   ;;  %v3258_v39 = vld [vmem:[%s3477_s13 + $0x164] ss:$8 sps:$4 sm:$0xff]  }
  0x66   : > { %v3260_v40 = vld [vmem:[%s3477_s13 + $0x364] ss:$8 sps:$4 sm:$0xff]  }
  0x6c   : > { %1258 = vmatmul.mubr.bf16.gmra.mxu0 %v3166_v41  ;;  %1514 = vmatmul.mubr.bf16.gmra.mxu1 %v3167_v42  ;;  %v3262_v41 = vld [vmem:[%s3477_s13 + $0x160] ss:$8 sps:$4 sm:$0xff]  }
  0x6d   : > { %2828 = vmatprep.mubr.msk.bf16.mxu0 %vm977_vm0, %v3168_v43  ;;  %2860 = vmatprep.mubr.msk.bf16.mxu1 %vm977_vm0, %v3170_v44  ;;  %v3263_v42 = vld [vmem:[%s3477_s13 + $0x360] ss:$8 sps:$4 sm:$0xff]   ;;  %v3264_v43 = vld [vmem:[%s3477_s13 + $0x174] ss:$8 sps:$4 sm:$0xff]  }
  0x6e   : > { %v3266_v44 = vld [vmem:[%s3477_s13 + $0x374] ss:$8 sps:$4 sm:$0xff]  }
  0x74   : > { %1266 = vmatmul.mubr.bf16.gmra.mxu0 %v3172_v45  ;;  %1522 = vmatmul.mubr.bf16.gmra.mxu1 %v3173_v46  ;;  %v3268_v45 = vld [vmem:[%s3477_s13 + $0x170] ss:$8 sps:$4 sm:$0xff]  }
  0x75   : > { %2829 = vmatprep.mubr.msk.bf16.mxu0 %vm977_vm0, %v3174_v47  ;;  %2861 = vmatprep.mubr.msk.bf16.mxu1 %vm977_vm0, %v3176_v48  ;;  %v3269_v46 = vld [vmem:[%s3477_s13 + $0x370] ss:$8 sps:$4 sm:$0xff]   ;;  %v3270_v47 = vld [vmem:[%s3477_s13 + $0x184] ss:$8 sps:$4 sm:$0xff]  }
  0x76   : > { %v3272_v48 = vld [vmem:[%s3477_s13 + $0x384] ss:$8 sps:$4 sm:$0xff]  }
  0x7c   : > { %1274 = vmatmul.mubr.bf16.gmra.mxu0 %v3178_v49  ;;  %1530 = vmatmul.mubr.bf16.gmra.mxu1 %v3179_v50  ;;  %v3274_v49 = vld [vmem:[%s3477_s13 + $0x180] ss:$8 sps:$4 sm:$0xff]  }
  0x7d   : > { %2830 = vmatprep.mubr.msk.bf16.mxu0 %vm977_vm0, %v3180_v51  ;;  %2862 = vmatprep.mubr.msk.bf16.mxu1 %vm977_vm0, %v3182_v52  ;;  %v3275_v50 = vld [vmem:[%s3477_s13 + $0x380] ss:$8 sps:$4 sm:$0xff]   ;;  %v3276_v51 = vld [vmem:[%s3477_s13 + $0x194] ss:$8 sps:$4 sm:$0xff]  }
  0x7e   : > { %v3278_v52 = vld [vmem:[%s3477_s13 + $0x394] ss:$8 sps:$4 sm:$0xff]  }
  0x84   : > { %1282 = vmatmul.mubr.bf16.gmra.mxu0 %v3184_v53  ;;  %1538 = vmatmul.mubr.bf16.gmra.mxu1 %v3185_v54  ;;  %v3653_v53 = vld [vmem:[%s4171_s2] ss:$0 sm:$0xff] }
  0x85   : > { %2831 = vmatprep.mubr.msk.bf16.mxu0 %vm977_vm0, %v3186_v55  ;;  %2863 = vmatprep.mubr.msk.bf16.mxu1 %vm977_vm0, %v3188_v56  ;;  %v3658_v55 = vld [vmem:[%s4172_s3] ss:$0 sm:$0xff] }
  0x8c   : > { %1290 = vmatmul.mubr.bf16.gmra.mxu0 %v3190_v57  ;;  %1546 = vmatmul.mubr.bf16.gmra.mxu1 %v3191_v58 }
  0x8d   : > { %2832 = vmatprep.mubr.msk.bf16.mxu0 %vm977_vm0, %v3192_v59  ;;  %2864 = vmatprep.mubr.msk.bf16.mxu1 %vm977_vm0, %v3194_v60 }
  0x94   : > { %1298 = vmatmul.mubr.bf16.gmra.mxu0 %v3196_v61  ;;  %1554 = vmatmul.mubr.bf16.gmra.mxu1 %v3197_v62 }
  0x95   : > { %2833 = vmatprep.mubr.msk.bf16.mxu0 %vm977_vm0, %v3198_v63  ;;  %2865 = vmatprep.mubr.msk.bf16.mxu1 %vm977_vm0, %v3200_v0 }
  0x9c   : > { %1306 = vmatmul.mubr.bf16.gmra.mxu0 %v3202_v1  ;;  %1562 = vmatmul.mubr.bf16.gmra.mxu1 %v3203_v2  ;;  %v3280_v1 = vld [vmem:[%s3477_s13 + $0x190] ss:$8 sps:$4 sm:$0xff]  }
  0x9d   : > { %2834 = vmatprep.mubr.msk.bf16.mxu0 %vm977_vm0, %v3204_v3  ;;  %2866 = vmatprep.mubr.msk.bf16.mxu1 %vm977_vm0, %v3206_v4  ;;  %v3281_v2 = vld [vmem:[%s3477_s13 + $0x390] ss:$8 sps:$4 sm:$0xff]  }
  0xa4   : > { %1314 = vmatmul.mubr.bf16.gmra.mxu0 %v3208_v5  ;;  %1570 = vmatmul.mubr.bf16.gmra.mxu1 %v3209_v6 }
  0xa5   : > { %2835 = vmatprep.mubr.msk.bf16.mxu0 %vm977_vm0, %v3210_v7  ;;  %2867 = vmatprep.mubr.msk.bf16.mxu1 %vm977_vm0, %v3212_v8  ;;  %v3282_v7 = vld [vmem:[%s3477_s13 + $0x1a4] ss:$8 sps:$4 sm:$0xff]  }
  0xa6   : > { %v3284_v8 = vld [vmem:[%s3477_s13 + $0x3a4] ss:$8 sps:$4 sm:$0xff]  }
  0xac   : > { %1322 = vmatmul.mubr.bf16.gmra.mxu0 %v3214_v9  ;;  %1578 = vmatmul.mubr.bf16.gmra.mxu1 %v3215_v10 }
  0xad   : > { %2836 = vmatprep.mubr.msk.bf16.mxu0 %vm977_vm0, %v3216_v11  ;;  %2868 = vmatprep.mubr.msk.bf16.mxu1 %vm977_vm0, %v3218_v12 }
  0xb4   : > { %1330 = vmatmul.mubr.bf16.gmra.mxu0 %v3220_v13  ;;  %1586 = vmatmul.mubr.bf16.gmra.mxu1 %v3221_v14 }
  0xb5   : > { %2837 = vmatprep.mubr.msk.bf16.mxu0 %vm977_vm0, %v3222_v15  ;;  %2869 = vmatprep.mubr.msk.bf16.mxu1 %vm977_vm0, %v3224_v16 }
  0xbc   : > { %1338 = vmatmul.mubr.bf16.gmra.mxu0 %v3226_v17  ;;  %1594 = vmatmul.mubr.bf16.gmra.mxu1 %v3227_v18 }
  0xbd   : > { %2838 = vmatprep.mubr.msk.bf16.mxu0 %vm977_vm0, %v3228_v19  ;;  %2870 = vmatprep.mubr.msk.bf16.mxu1 %vm977_vm0, %v3230_v20 }
  0xc4   : > { %1346 = vmatmul.mubr.bf16.gmra.mxu0 %v3232_v21  ;;  %1602 = vmatmul.mubr.bf16.gmra.mxu1 %v3233_v22 }
  0xc5   : > { %2839 = vmatprep.mubr.msk.bf16.mxu0 %vm977_vm0, %v3234_v23  ;;  %2871 = vmatprep.mubr.msk.bf16.mxu1 %vm977_vm0, %v3236_v24 }
  0xcc   : > { %1354 = vmatmul.mubr.bf16.gmra.mxu0 %v3238_v25  ;;  %1610 = vmatmul.mubr.bf16.gmra.mxu1 %v3239_v26 }
  0xcd   : > { %2840 = vmatprep.mubr.msk.bf16.mxu0 %vm977_vm0, %v3240_v27  ;;  %2872 = vmatprep.mubr.msk.bf16.mxu1 %vm977_vm0, %v3242_v28  ;;  %v3286_v27 = vld [vmem:[%s3477_s13 + $0x1a0] ss:$8 sps:$4 sm:$0xff]  }
  0xce   : > { %v3287_v28 = vld [vmem:[%s3477_s13 + $0x3a0] ss:$8 sps:$4 sm:$0xff]  }
  0xd4   : > { %1362 = vmatmul.mubr.bf16.gmra.mxu0 %v3244_v29  ;;  %1618 = vmatmul.mubr.bf16.gmra.mxu1 %v3245_v30 }
  0xd5   : > { %2841 = vmatprep.mubr.msk.bf16.mxu0 %vm977_vm0, %v3246_v31  ;;  %2873 = vmatprep.mubr.msk.bf16.mxu1 %vm977_vm0, %v3248_v32  ;;  %v3288_v32 = vld [vmem:[%s3477_s13 + $0x1b4] ss:$8 sps:$4 sm:$0xff]  }
  0xdc   : > { %1370 = vmatmul.mubr.bf16.gmra.mxu0 %v3250_v33  ;;  %1626 = vmatmul.mubr.bf16.gmra.mxu1 %v3251_v34  ;;  %v3290_v33 = vld [vmem:[%s3477_s13 + $0x3b4] ss:$8 sps:$4 sm:$0xff]  }
  0xdd   : > { %2842 = vmatprep.mubr.msk.bf16.mxu0 %vm977_vm0, %v3252_v35  ;;  %2874 = vmatprep.mubr.msk.bf16.mxu1 %vm977_vm0, %v3254_v36 }
  0xe4   : > { %1378 = vmatmul.mubr.bf16.gmra.mxu0 %v3256_v37  ;;  %1634 = vmatmul.mubr.bf16.gmra.mxu1 %v3257_v38 }
  0xe5   : > { %2843 = vmatprep.mubr.msk.bf16.mxu0 %vm977_vm0, %v3258_v39  ;;  %2875 = vmatprep.mubr.msk.bf16.mxu1 %vm977_vm0, %v3260_v40 }
  0xec   : > { %1386 = vmatmul.mubr.bf16.gmra.mxu0 %v3262_v41  ;;  %1642 = vmatmul.mubr.bf16.gmra.mxu1 %v3263_v42 }
  0xed   : > { %2844 = vmatprep.mubr.msk.bf16.mxu0 %vm977_vm0, %v3264_v43  ;;  %2876 = vmatprep.mubr.msk.bf16.mxu1 %vm977_vm0, %v3266_v44 }
  0xf4   : > { %1394 = vmatmul.mubr.bf16.gmra.mxu0 %v3268_v45  ;;  %1650 = vmatmul.mubr.bf16.gmra.mxu1 %v3269_v46 }
  0xf5   : > { %2845 = vmatprep.mubr.msk.bf16.mxu0 %vm977_vm0, %v3270_v47  ;;  %2877 = vmatprep.mubr.msk.bf16.mxu1 %vm977_vm0, %v3272_v48 }
  0xfc   : > { %v1211_v54 = vpop.f32.mrf.mxu0  ;;  %1402 = vmatmul.mubr.bf16.gmra.mxu0 %v3274_v49  ;;  %v1467_v56 = vpop.f32.mrf.mxu1  ;;  %1658 = vmatmul.mubr.bf16.gmra.mxu1 %v3275_v50 }
  0xfd   : > { %v1729_v57 = vmul.f32 %v3653_v53, %v1211_v54  ;;  %v1793_v58 = vmul.f32 %v3653_v53, %v1467_v56  ;;  %2846 = vmatprep.mubr.msk.bf16.mxu0 %vm977_vm0, %v3276_v51  ;;  %2878 = vmatprep.mubr.msk.bf16.mxu1 %vm977_vm0, %v3278_v52  ;;  %v3292_v56 = vld [vmem:[%s3477_s13 + $0x1b0] ss:$8 sps:$4 sm:$0xff]  }
  0xfe   : > { %v1213_v59 = vpop.f32.mrf.mxu0  ;;  %v1469_v60 = vpop.f32.mrf.mxu1 }
  0xff   : > { %v1864_v61 = vadd.f32 %v3658_v55, %v1729_v57  ;;  %v1928_v62 = vadd.f32 %v3658_v55, %v1793_v58  ;;  %v3293_v57 = vld [vmem:[%s3477_s13 + $0x3b0] ss:$8 sps:$4 sm:$0xff]  }
 0x100   : > { %v1214_v63 = vpop.f32.mrf.mxu0  ;;  %v1470_v0 = vpop.f32.mrf.mxu1 }
 0x101   : > { %v1992_v3 = vmax.f32 %v1864_v61, 0.0  ;;  %v2056_v4 = vmax.f32 %v1928_v62, 0.0  ;;  %v1730_v5 = vmul.f32 %v3653_v53, %v1214_v63  ;;  %v1794_v6 = vmul.f32 %v3653_v53, %v1470_v0  ;;  %v3294_v62 = vld [vmem:[%s3477_s13 + $0x1c4] ss:$8 sps:$4 sm:$0xff]  }
 0x102   : > { %v1216_v9 = vpop.f32.mrf.mxu0  ;;  %v1472_v10 = vpop.f32.mrf.mxu1  ;;  %v3296_v63 = vld [vmem:[%s3477_s13 + $0x3c4] ss:$8 sps:$4 sm:$0xff]  }
 0x103   : > { %v3672_v11 = vmax.f32 %v1992_v3, %v2056_v4  ;;  %v1865_v12 = vadd.f32 %v3658_v55, %v1730_v5  ;;  %v1929_v13 = vadd.f32 %v3658_v55, %v1794_v6 }
 0x104   : > { %v1219_v14 = vpop.f32.mrf.mxu0  ;;  %1410 = vmatmul.mubr.bf16.gmra.mxu0 %v3280_v1  ;;  %v1475_v15 = vpop.f32.mrf.mxu1  ;;  %1666 = vmatmul.mubr.bf16.gmra.mxu1 %v3281_v2 }
 0x105   : > { %v1993_v16 = vmax.f32 %v1865_v12, 0.0  ;;  %v2057_v17 = vmax.f32 %v1929_v13, 0.0  ;;  %v1731_v18 = vmul.f32 %v3653_v53, %v1219_v14  ;;  %2847 = vmatprep.mubr.msk.bf16.mxu0 %vm977_vm0, %v3282_v7  ;;  %2879 = vmatprep.mubr.msk.bf16.mxu1 %vm977_vm0, %v3284_v8  ;;  %v1795_v19 = vmul.f32 %v3653_v53, %v1475_v15 }
 0x106   : > { %v1221_v20 = vpop.f32.mrf.mxu0  ;;  %v1477_v21 = vpop.f32.mrf.mxu1 }
 0x107   : > { %v3680_v22 = vmax.f32 %v1993_v16, %v2057_v17  ;;  %v1866_v23 = vadd.f32 %v3658_v55, %v1731_v18  ;;  %v1930_v24 = vadd.f32 %v3658_v55, %v1795_v19  ;;  %v3298_v21 = vld [vmem:[%s3477_s13 + $0x1c0] ss:$8 sps:$4 sm:$0xff]  }
 0x108   : > { %v1222_v25 = vpop.f32.mrf.mxu0  ;;  %v1478_v26 = vpop.f32.mrf.mxu1 }
 0x109   : > { %v1994_v29 = vmax.f32 %v1866_v23, 0.0  ;;  %v1732_v30 = vmul.f32 %v3653_v53, %v1222_v25  ;;  %v1796_v31 = vmul.f32 %v3653_v53, %v1478_v26  ;;  %v2058_v34 = vmax.f32 %v1930_v24, 0.0  ;;  %v3299_v23 = vld [vmem:[%s3477_s13 + $0x3c0] ss:$8 sps:$4 sm:$0xff]  }
 0x10a   : > { %v1224_v35 = vpop.f32.mrf.mxu0  ;;  %v1480_v36 = vpop.f32.mrf.mxu1 }
 0x10b   : > { %v1867_v37 = vadd.f32 %v3658_v55, %v1732_v30  ;;  %v1931_v38 = vadd.f32 %v3658_v55, %v1796_v31  ;;  %v2122_v39 = vmax.f32 %v1994_v29, %v2058_v34  ;;  %v3302_v29 = vld [vmem:[%s3477_s13 + $0x3d4] ss:$8 sps:$4 sm:$0xff]  }
 0x10c   : > { %v1227_v40 = vpop.f32.mrf.mxu0  ;;  %1418 = vmatmul.mubr.bf16.gmra.mxu0 %v3286_v27  ;;  %v1483_v41 = vpop.f32.mrf.mxu1  ;;  %1674 = vmatmul.mubr.bf16.gmra.mxu1 %v3287_v28  ;;  %v3300_v28 = vld [vmem:[%s3477_s13 + $0x1d4] ss:$8 sps:$4 sm:$0xff]  }
 0x10d   : > { %v1995_v42 = vmax.f32 %v1867_v37, 0.0  ;;  %v2059_v43 = vmax.f32 %v1931_v38, 0.0  ;;  %v1733_v44 = vmul.f32 %v3653_v53, %v1227_v40  ;;  %v1797_v45 = vmul.f32 %v3653_v53, %v1483_v41  ;;  %2848 = vmatprep.mubr.msk.bf16.mxu0 %vm977_vm0, %v3288_v32  ;;  %2880 = vmatprep.mubr.msk.bf16.mxu1 %vm977_vm0, %v3290_v33 }
 0x10e   : > { %v3696_v46 = vmax.f32 %v2122_v39, %v2056_v4  ;;  %v1229_v47 = vpop.f32.mrf.mxu0  ;;  %v1485_v48 = vpop.f32.mrf.mxu1 }
 0x10f   : > { %v2123_v49 = vmax.f32 %v1995_v42, %v2059_v43  ;;  %v1868_v50 = vadd.f32 %v3658_v55, %v1733_v44  ;;  %v1932_v51 = vadd.f32 %v3658_v55, %v1797_v45 }
 0x110   : > { %v1230_v52 = vpop.f32.mrf.mxu0  ;;  %v1486_v54 = vpop.f32.mrf.mxu1 }
 0x111   : > { %v3702_v58 = vmax.f32 %v2123_v49, %v2057_v17  ;;  %v1996_v59 = vmax.f32 %v1868_v50, 0.0  ;;  %v2060_v60 = vmax.f32 %v1932_v51, 0.0  ;;  %v1734_v61 = vmul.f32 %v3653_v53, %v1230_v52  ;;  %v3304_v51 = vld [vmem:[%s3477_s13 + $0x1d0] ss:$8 sps:$4 sm:$0xff]  }
 0x112   : > { %v1798_v0 = vmul.f32 %v3653_v53, %v1486_v54  ;;  %v1232_v1 = vpop.f32.mrf.mxu0  ;;  %v1488_v2 = vpop.f32.mrf.mxu1  ;;  %v3305_v52 = vld [vmem:[%s3477_s13 + $0x3d0] ss:$8 sps:$4 sm:$0xff]  }
 0x113   : > { %v2124_v3 = vmax.f32 %v1996_v59, %v2060_v60  ;;  %v1869_v4 = vadd.f32 %v3658_v55, %v1734_v61  ;;  %v3308_v61 = vld [vmem:[%s3477_s13 + $0x3e4] ss:$8 sps:$4 sm:$0xff]  }
 0x114   : > { %v1933_v5 = vadd.f32 %v3658_v55, %v1798_v0  ;;  %v1235_v6 = vpop.f32.mrf.mxu0  ;;  %1426 = vmatmul.mubr.bf16.gmra.mxu0 %v3292_v56  ;;  %v1491_v7 = vpop.f32.mrf.mxu1  ;;  %1682 = vmatmul.mubr.bf16.gmra.mxu1 %v3293_v57 }
 0x115   : > { %v3710_v8 = vmax.f32 %v2124_v3, %v2058_v34  ;;  %v1997_v9 = vmax.f32 %v1869_v4, 0.0  ;;  %v1735_v10 = vmul.f32 %v3653_v53, %v1235_v6  ;;  %v1799_v12 = vmul.f32 %v3653_v53, %v1491_v7  ;;  %2849 = vmatprep.mubr.msk.bf16.mxu0 %vm977_vm0, %v3294_v62  ;;  %2881 = vmatprep.mubr.msk.bf16.mxu1 %vm977_vm0, %v3296_v63 }
 0x116   : > { %v2061_v13 = vmax.f32 %v1933_v5, 0.0  ;;  %v1237_v14 = vpop.f32.mrf.mxu0  ;;  %v1493_v15 = vpop.f32.mrf.mxu1 }
 0x117   : > { %v1870_v16 = vadd.f32 %v3658_v55, %v1735_v10  ;;  %v1934_v17 = vadd.f32 %v3658_v55, %v1799_v12 }
 0x118   : > { %v2125_v18 = vmax.f32 %v1997_v9, %v2061_v13  ;;  %v1238_v19 = vpop.f32.mrf.mxu0  ;;  %v1494_v20 = vpop.f32.mrf.mxu1 }
 0x119   : > { %v1998_v24 = vmax.f32 %v1870_v16, 0.0  ;;  %v2062_v25 = vmax.f32 %v1934_v17, 0.0  ;;  %v1736_v26 = vmul.f32 %v3653_v53, %v1238_v19  ;;  %v1800_v27 = vmul.f32 %v3653_v53, %v1494_v20  ;;  %v3310_v20 = vld [vmem:[%s3477_s13 + $0x1e0] ss:$8 sps:$4 sm:$0xff]  }
 0x11a   : > { %v3724_v30 = vmax.f32 %v2125_v18, %v2059_v43  ;;  %v1240_v31 = vpop.f32.mrf.mxu0  ;;  %v1496_v32 = vpop.f32.mrf.mxu1 }
 0x11b   : > { %v2126_v33 = vmax.f32 %v1998_v24, %v2062_v25  ;;  %v1871_v34 = vadd.f32 %v3658_v55, %v1736_v26  ;;  %v1935_v35 = vadd.f32 %v3658_v55, %v1800_v27 }
 0x11c   : > { %v1243_v36 = vpop.f32.mrf.mxu0  ;;  %1434 = vmatmul.mubr.bf16.gmra.mxu0 %v3298_v21  ;;  %v1499_v37 = vpop.f32.mrf.mxu1  ;;  %1690 = vmatmul.mubr.bf16.gmra.mxu1 %v3299_v23  ;;  %v3311_v21 = vld [vmem:[%s3477_s13 + $0x3e0] ss:$8 sps:$4 sm:$0xff]  }
 0x11d   : > { %v3728_v38 = vmax.f32 %v2126_v33, %v2060_v60  ;;  %v1999_v39 = vmax.f32 %v1871_v34, 0.0  ;;  %v2063_v40 = vmax.f32 %v1935_v35, 0.0  ;;  %v1737_v41 = vmul.f32 %v3653_v53, %v1243_v36  ;;  %2850 = vmatprep.mubr.msk.bf16.mxu0 %vm977_vm0, %v3300_v28  ;;  %2882 = vmatprep.mubr.msk.bf16.mxu1 %vm977_vm0, %v3302_v29  ;;  %v3306_v60 = vld [vmem:[%s3477_s13 + $0x1e4] ss:$8 sps:$4 sm:$0xff]   ;;  %v3312_v28 = vld [vmem:[%s3477_s13 + $0x1f4] ss:$8 sps:$4 sm:$0xff]  }
 0x11e   : > { %v1801_v42 = vmul.f32 %v3653_v53, %v1499_v37  ;;  %v1245_v43 = vpop.f32.mrf.mxu0  ;;  %v1501_v44 = vpop.f32.mrf.mxu1 }
 0x11f   : > { %v2127_v45 = vmax.f32 %v1999_v39, %v2063_v40  ;;  %v1872_v47 = vadd.f32 %v3658_v55, %v1737_v41 }
 0x120   : > { %v1936_v48 = vadd.f32 %v3658_v55, %v1801_v42  ;;  %v1246_v49 = vpop.f32.mrf.mxu0  ;;  %v1502_v50 = vpop.f32.mrf.mxu1 }
 0x121   : > { %v3738_v54 = vmax.f32 %v2127_v45, %v2061_v13  ;;  %v2000_v56 = vmax.f32 %v1872_v47, 0.0  ;;  %v1738_v57 = vmul.f32 %v3653_v53, %v1246_v49  ;;  %v1802_v59 = vmul.f32 %v3653_v53, %v1502_v50 }
 0x122   : > { %v2064_v62 = vmax.f32 %v1936_v48, 0.0  ;;  %v1248_v63 = vpop.f32.mrf.mxu0  ;;  %v1504_v0 = vpop.f32.mrf.mxu1 }
 0x123   : > { %v1873_v1 = vadd.f32 %v3658_v55, %v1738_v57  ;;  %v1937_v2 = vadd.f32 %v3658_v55, %v1802_v59 }
 0x124   : > { %v2128_v3 = vmax.f32 %v2000_v56, %v2064_v62  ;;  %v1251_v4 = vpop.f32.mrf.mxu0  ;;  %1442 = vmatmul.mubr.bf16.gmra.mxu0 %v3304_v51  ;;  %v1507_v5 = vpop.f32.mrf.mxu1  ;;  %1698 = vmatmul.mubr.bf16.gmra.mxu1 %v3305_v52  ;;  %v3316_v52 = vld [vmem:[%s3477_s13 + $0x1f0] ss:$8 sps:$4 sm:$0xff]  }
 0x125   : > { %v2001_v6 = vmax.f32 %v1873_v1, 0.0  ;;  %v2065_v7 = vmax.f32 %v1937_v2, 0.0  ;;  %v1739_v9 = vmul.f32 %v3653_v53, %v1251_v4  ;;  %v1803_v10 = vmul.f32 %v3653_v53, %v1507_v5  ;;  %2851 = vmatprep.mubr.msk.bf16.mxu0 %vm977_vm0, %v3306_v60  ;;  %2883 = vmatprep.mubr.msk.bf16.mxu1 %vm977_vm0, %v3308_v61  ;;  %v3317_v56 = vld [vmem:[%s3477_s13 + $0x3f0] ss:$8 sps:$4 sm:$0xff]  }
 0x126   : > { %v3750_v12 = vmax.f32 %v2128_v3, %v2062_v25  ;;  %v1253_v13 = vpop.f32.mrf.mxu0  ;;  %v1509_v14 = vpop.f32.mrf.mxu1  ;;  %v3314_v25 = vld [vmem:[%s3477_s13 + $0x3f4] ss:$8 sps:$4 sm:$0xff]   ;;  %s188_s13 = sand.u32 1, %s3372_s16  }
 0x127   : > { %v2129_v15 = vmax.f32 %v2001_v6, %v2065_v7  ;;  %v1874_v16 = vadd.f32 %v3658_v55, %v1739_v9  ;;  %v1938_v17 = vadd.f32 %v3658_v55, %v1803_v10  ;;  %s2680_s14 = sshll.u32 %s188_s13, 7  ;;  %s4129_s8 = scalar_lea.sflag [#allocation3], %s188_s13 }
 0x128   : > { %v1254_v18 = vpop.f32.mrf.mxu0  ;;  %v1510_v19 = vpop.f32.mrf.mxu1  ;;  %s3928_s23 = scalar_lea.vmem [#allocation2], %s2680_s14 }
 0x129   : > { %v3756_v23 = vmax.f32 %v2129_v15, %v2063_v40  ;;  %v2002_v24 = vmax.f32 %v1874_v16, 0.0  ;;  %v2066_v26 = vmax.f32 %v1938_v17, 0.0  ;;  %v1740_v27 = vmul.f32 %v3653_v53, %v1254_v18  ;;  %s2614_s30 = sshll.u32 %s3928_s23, 4  ;;  %s4124_s30 = int_to_ptr.vmem [resolvable:$true] %s2614_s30 }
 0x12a   : > { %v1804_v29 = vmul.f32 %v3653_v53, %v1510_v19  ;;  %v1256_v31 = vpop.f32.mrf.mxu0  ;;  %v1512_v32 = vpop.f32.mrf.mxu1  ;;  %s3320_s19 = scalar_lea.vmem %s4124_s30, 2048  ;;  %p3327_p0 = scmp.lt.s32.totalorder %s4124_s30, %s3325_s10 }
 0x12b   : > { %v2130_v33 = vmax.f32 %v2002_v24, %v2066_v26  ;;  %v1875_v34 = vadd.f32 %v3658_v55, %v1740_v27  ;;  %p3321_p11 = scmp.ne.s32.totalorder %s4124_s30, %s3320_s19  ;;  %p3328_p1 = scmp.lt.s32.totalorder %s3326_s11, %s3320_s19 }
 0x12c   : > { %v1939_v35 = vadd.f32 %v3658_v55, %v1804_v29  ;;  %v1259_v36 = vpop.f32.mrf.mxu0  ;;  %1450 = vmatmul.mubr.bf16.gmra.mxu0 %v3310_v20  ;;  %v1515_v37 = vpop.f32.mrf.mxu1  ;;  %1706 = vmatmul.mubr.bf16.gmra.mxu1 %v3311_v21 }
 0x12d   : > { %v3764_v39 = vmax.f32 %v2130_v33, %v2064_v62  ;;  %v2003_v40 = vmax.f32 %v1875_v34, 0.0  ;;  %v1741_v41 = vmul.f32 %v3653_v53, %v1259_v36  ;;  %v1805_v42 = vmul.f32 %v3653_v53, %v1515_v37  ;;  %2852 = vmatprep.mubr.msk.bf16.mxu0 %vm977_vm0, %v3312_v28  ;;  %2884 = vmatprep.mubr.msk.bf16.mxu1 %vm977_vm0, %v3314_v25  ;;  %p3322_p12 = pnand %p3321_p11, %p3450_p5  ;;  %p3329_p2 = por %p3328_p1, %p3327_p0 }
 0x12e   : > { %v2067_v43 = vmax.f32 %v1939_v35, 0.0  ;;  %v1261_v44 = vpop.f32.mrf.mxu0  ;;  %v1517_v45 = vpop.f32.mrf.mxu1 }
 0x12f   : > { %v1876_v47 = vadd.f32 %v3658_v55, %v1741_v41  ;;  %v1940_v48 = vadd.f32 %v3658_v55, %v1805_v42  ;;  %p3323_p13 = pneg %p3322_p12 }
 0x130   : > { %v2131_v49 = vmax.f32 %v2003_v40, %v2067_v43  ;;  %v1262_v50 = vpop.f32.mrf.mxu0  ;;  %v1518_v51 = vpop.f32.mrf.mxu1 }
 0x131   : > { %v2004_v57 = vmax.f32 %v1876_v47, 0.0  ;;  %v2068_v59 = vmax.f32 %v1940_v48, 0.0  ;;  %v1742_v60 = vmul.f32 %v3653_v53, %v1262_v50  ;;  %v1806_v61 = vmul.f32 %v3653_v53, %v1518_v51  ;;  %p3330_p3 = pnand %p3329_p2, %p3323_p13 }
 0x132   : > { %v3776_v62 = vmax.f32 %v2131_v49, %v2065_v7  ;;  %v1264_v63 = vpop.f32.mrf.mxu0  ;;  %v1520_v0 = vpop.f32.mrf.mxu1 }
 0x133   : > { %v2132_v1 = vmax.f32 %v2004_v57, %v2068_v59  ;;  %v1877_v2 = vadd.f32 %v3658_v55, %v1742_v60  ;;  %v1941_v3 = vadd.f32 %v3658_v55, %v1806_v61 }
 0x134   : > { %v1267_v4 = vpop.f32.mrf.mxu0  ;;  %1458 = vmatmul.mubr.bf16.gmra.mxu0 %v3316_v52  ;;  %v1523_v5 = vpop.f32.mrf.mxu1  ;;  %1714 = vmatmul.mubr.bf16.gmra.mxu1 %v3317_v56 }
 0x135   : > { %v3780_v6 = vmax.f32 %v2132_v1, %v2066_v26  ;;  %v2005_v9 = vmax.f32 %v1877_v2, 0.0  ;;  %v2069_v10 = vmax.f32 %v1941_v3, 0.0  ;;  %v1743_v13 = vmul.f32 %v3653_v53, %v1267_v4 }
 0x136   : > { %v1807_v7 = vmul.f32 %v3653_v53, %v1523_v5  ;;  %v1269_v14 = vpop.f32.mrf.mxu0  ;;  %v1525_v15 = vpop.f32.mrf.mxu1 }
 0x137   : > { %v2133_v16 = vmax.f32 %v2005_v9, %v2069_v10  ;;  %v1878_v17 = vadd.f32 %v3658_v55, %v1743_v13 }
 0x138   : > { %v1942_v18 = vadd.f32 %v3658_v55, %v1807_v7  ;;  %v1270_v19 = vpop.f32.mrf.mxu0  ;;  %v1526_v20 = vpop.f32.mrf.mxu1 }
 0x139   : > { %v3786_v21 = vmax.f32 %v2133_v16, %v2067_v43  ;;  %v2006_v24 = vmax.f32 %v1878_v17, 0.0  ;;  %v1744_v26 = vmul.f32 %v3653_v53, %v1270_v19  ;;  %v1808_v27 = vmul.f32 %v3653_v53, %v1526_v20 }
 0x13a   : > { %v2070_v28 = vmax.f32 %v1942_v18, 0.0  ;;  %v1272_v25 = vpop.f32.mrf.mxu0  ;;  %v1528_v29 = vpop.f32.mrf.mxu1 }
 0x13b   : > { %v1879_v31 = vadd.f32 %v3658_v55, %v1744_v26  ;;  %v1943_v32 = vadd.f32 %v3658_v55, %v1808_v27 }
 0x13c   : > { %v2134_v33 = vmax.f32 %v2006_v24, %v2070_v28  ;;  %v1275_v34 = vpop.f32.mrf.mxu0  ;;  %v1531_v35 = vpop.f32.mrf.mxu1 }
 0x13d   : > { %v2007_v36 = vmax.f32 %v1879_v31, 0.0  ;;  %v2071_v37 = vmax.f32 %v1943_v32, 0.0  ;;  %v1745_v40 = vmul.f32 %v3653_v53, %v1275_v34  ;;  %v1809_v41 = vmul.f32 %v3653_v53, %v1531_v35 }
 0x13e   : > { %v3794_v42 = vmax.f32 %v2134_v33, %v2068_v59  ;;  %v1277_v43 = vpop.f32.mrf.mxu0  ;;  %v1533_v44 = vpop.f32.mrf.mxu1 }
 0x13f   : > { %v2135_v45 = vmax.f32 %v2007_v36, %v2071_v37  ;;  %v1880_v47 = vadd.f32 %v3658_v55, %v1745_v40  ;;  %v1944_v48 = vadd.f32 %v3658_v55, %v1809_v41 }
 0x140   : > { %v1278_v49 = vpop.f32.mrf.mxu0  ;;  %v1534_v50 = vpop.f32.mrf.mxu1 }
 0x141   : > { %v3798_v51 = vmax.f32 %v2135_v45, %v2069_v10  ;;  %v2008_v52 = vmax.f32 %v1880_v47, 0.0  ;;  %v2072_v56 = vmax.f32 %v1944_v48, 0.0  ;;  %v1746_v57 = vmul.f32 %v3653_v53, %v1278_v49 }
 0x142   : > { %v1810_v60 = vmul.f32 %v3653_v53, %v1534_v50  ;;  %v1280_v61 = vpop.f32.mrf.mxu0  ;;  %v1536_v59 = vpop.f32.mrf.mxu1 }
 0x143   : > { %v2136_v63 = vmax.f32 %v2008_v52, %v2072_v56  ;;  %v1881_v0 = vadd.f32 %v3658_v55, %v1746_v57 }
 0x144   : > { %v1945_v1 = vadd.f32 %v3658_v55, %v1810_v60  ;;  %v1283_v2 = vpop.f32.mrf.mxu0  ;;  %v1539_v3 = vpop.f32.mrf.mxu1 }
 0x145   : > { %v3804_v4 = vmax.f32 %v2136_v63, %v2070_v28  ;;  %v2009_v5 = vmax.f32 %v1881_v0, 0.0  ;;  %v1747_v9 = vmul.f32 %v3653_v53, %v1283_v2  ;;  %v1811_v10 = vmul.f32 %v3653_v53, %v1539_v3 }
 0x146   : > { %v2073_v13 = vmax.f32 %v1945_v1, 0.0  ;;  %v1285_v7 = vpop.f32.mrf.mxu0  ;;  %v1541_v14 = vpop.f32.mrf.mxu1 }
 0x147   : > { %v1882_v15 = vadd.f32 %v3658_v55, %v1747_v9  ;;  %v1946_v16 = vadd.f32 %v3658_v55, %v1811_v10 }
 0x148   : > { %v2137_v17 = vmax.f32 %v2009_v5, %v2073_v13  ;;  %v1286_v18 = vpop.f32.mrf.mxu0  ;;  %v1542_v19 = vpop.f32.mrf.mxu1 }
 0x149   : > { %v2010_v20 = vmax.f32 %v1882_v15, 0.0  ;;  %v2074_v24 = vmax.f32 %v1946_v16, 0.0  ;;  %v1748_v26 = vmul.f32 %v3653_v53, %v1286_v18  ;;  %v1812_v27 = vmul.f32 %v3653_v53, %v1542_v19 }
 0x14a   : > { %v3812_v28 = vmax.f32 %v2137_v17, %v2071_v37  ;;  %v1288_v25 = vpop.f32.mrf.mxu0  ;;  %v1544_v29 = vpop.f32.mrf.mxu1 }
 0x14b   : > { %v2138_v31 = vmax.f32 %v2010_v20, %v2074_v24  ;;  %v1883_v32 = vadd.f32 %v3658_v55, %v1748_v26  ;;  %v1947_v33 = vadd.f32 %v3658_v55, %v1812_v27 }
 0x14c   : > { %v1291_v34 = vpop.f32.mrf.mxu0  ;;  %v1547_v35 = vpop.f32.mrf.mxu1 }
 0x14d   : > { %v3816_v36 = vmax.f32 %v2138_v31, %v2072_v56  ;;  %v2011_v40 = vmax.f32 %v1883_v32, 0.0  ;;  %v2075_v41 = vmax.f32 %v1947_v33, 0.0  ;;  %v1749_v43 = vmul.f32 %v3653_v53, %v1291_v34 }
 0x14e   : > { %v1813_v44 = vmul.f32 %v3653_v53, %v1547_v35  ;;  %v1293_v45 = vpop.f32.mrf.mxu0  ;;  %v1549_v37 = vpop.f32.mrf.mxu1 }
 0x14f   : > { %v2139_v47 = vmax.f32 %v2011_v40, %v2075_v41  ;;  %v1884_v48 = vadd.f32 %v3658_v55, %v1749_v43 }
 0x150   : > { %v1948_v49 = vadd.f32 %v3658_v55, %v1813_v44  ;;  %v1294_v50 = vpop.f32.mrf.mxu0  ;;  %v1550_v52 = vpop.f32.mrf.mxu1 }
 0x151   : > { %v3822_v57 = vmax.f32 %v2139_v47, %v2073_v13  ;;  %v2012_v60 = vmax.f32 %v1884_v48, 0.0  ;;  %v1750_v56 = vmul.f32 %v3653_v53, %v1294_v50  ;;  %v1814_v61 = vmul.f32 %v3653_v53, %v1550_v52 }
 0x152   : > { %v2076_v59 = vmax.f32 %v1948_v49, 0.0  ;;  %v1296_v63 = vpop.f32.mrf.mxu0  ;;  %v1552_v0 = vpop.f32.mrf.mxu1 }
 0x153   : > { %v1885_v1 = vadd.f32 %v3658_v55, %v1750_v56  ;;  %v1949_v2 = vadd.f32 %v3658_v55, %v1814_v61 }
 0x154   : > { %v2140_v3 = vmax.f32 %v2012_v60, %v2076_v59  ;;  %v1299_v5 = vpop.f32.mrf.mxu0  ;;  %v1555_v9 = vpop.f32.mrf.mxu1 }
 0x155   : > { %v2013_v10 = vmax.f32 %v1885_v1, 0.0  ;;  %v2077_v7 = vmax.f32 %v1949_v2, 0.0  ;;  %v1751_v13 = vmul.f32 %v3653_v53, %v1299_v5  ;;  %v1815_v14 = vmul.f32 %v3653_v53, %v1555_v9 }
 0x156   : > { %v3830_v15 = vmax.f32 %v2140_v3, %v2074_v24  ;;  %v1301_v16 = vpop.f32.mrf.mxu0  ;;  %v1557_v17 = vpop.f32.mrf.mxu1 }
 0x157   : > { %v2141_v18 = vmax.f32 %v2013_v10, %v2077_v7  ;;  %v1886_v19 = vadd.f32 %v3658_v55, %v1751_v13  ;;  %v1950_v20 = vadd.f32 %v3658_v55, %v1815_v14 }
 0x158   : > { %v1302_v26 = vpop.f32.mrf.mxu0  ;;  %v1558_v27 = vpop.f32.mrf.mxu1 }
 0x159   : > { %v3834_v25 = vmax.f32 %v2141_v18, %v2075_v41  ;;  %v2014_v29 = vmax.f32 %v1886_v19, 0.0  ;;  %v2078_v31 = vmax.f32 %v1950_v20, 0.0  ;;  %v1752_v32 = vmul.f32 %v3653_v53, %v1302_v26 }
 0x15a   : > { %v1816_v33 = vmul.f32 %v3653_v53, %v1558_v27  ;;  %v1304_v34 = vpop.f32.mrf.mxu0  ;;  %v1560_v24 = vpop.f32.mrf.mxu1 }
 0x15b   : > { %v2142_v35 = vmax.f32 %v2014_v29, %v2078_v31  ;;  %v1887_v40 = vadd.f32 %v3658_v55, %v1752_v32 }
 0x15c   : > { %v1951_v43 = vadd.f32 %v3658_v55, %v1816_v33  ;;  %v1307_v44 = vpop.f32.mrf.mxu0  ;;  %v1563_v45 = vpop.f32.mrf.mxu1 }
 0x15d   : > { %v3840_v37 = vmax.f32 %v2142_v35, %v2076_v59  ;;  %v2015_v47 = vmax.f32 %v1887_v40, 0.0  ;;  %v1753_v41 = vmul.f32 %v3653_v53, %v1307_v44  ;;  %v1817_v48 = vmul.f32 %v3653_v53, %v1563_v45 }
 0x15e   : > { %v2079_v49 = vmax.f32 %v1951_v43, 0.0  ;;  %v1309_v50 = vpop.f32.mrf.mxu0  ;;  %v1565_v52 = vpop.f32.mrf.mxu1 }
 0x15f   : > { %v1888_v60 = vadd.f32 %v3658_v55, %v1753_v41  ;;  %v1952_v56 = vadd.f32 %v3658_v55, %v1817_v48 }
 0x160   : > { %v2143_v61 = vmax.f32 %v2015_v47, %v2079_v49  ;;  %v1310_v63 = vpop.f32.mrf.mxu0  ;;  %v1566_v0 = vpop.f32.mrf.mxu1 }
 0x161   : > { %v2016_v1 = vmax.f32 %v1888_v60, 0.0  ;;  %v2080_v2 = vmax.f32 %v1952_v56, 0.0  ;;  %v1754_v59 = vmul.f32 %v3653_v53, %v1310_v63  ;;  %v1818_v3 = vmul.f32 %v3653_v53, %v1566_v0 }
 0x162   : > { %v3848_v5 = vmax.f32 %v2143_v61, %v2077_v7  ;;  %v1312_v9 = vpop.f32.mrf.mxu0  ;;  %v1568_v10 = vpop.f32.mrf.mxu1 }
 0x163   : > { %v2144_v13 = vmax.f32 %v2016_v1, %v2080_v2  ;;  %v1889_v14 = vadd.f32 %v3658_v55, %v1754_v59  ;;  %v1953_v16 = vadd.f32 %v3658_v55, %v1818_v3 }
 0x164   : > { %v1315_v17 = vpop.f32.mrf.mxu0  ;;  %v1571_v18 = vpop.f32.mrf.mxu1 }
 0x165   : > { %v3852_v19 = vmax.f32 %v2144_v13, %v2078_v31  ;;  %v2017_v20 = vmax.f32 %v1889_v14, 0.0  ;;  %v2081_v26 = vmax.f32 %v1953_v16, 0.0  ;;  %v1755_v27 = vmul.f32 %v3653_v53, %v1315_v17 }
 0x166   : > { %v1819_v29 = vmul.f32 %v3653_v53, %v1571_v18  ;;  %v1317_v32 = vpop.f32.mrf.mxu0  ;;  %v1573_v7 = vpop.f32.mrf.mxu1 }
 0x167   : > { %v2145_v33 = vmax.f32 %v2017_v20, %v2081_v26  ;;  %v1890_v34 = vadd.f32 %v3658_v55, %v1755_v27 }
 0x168   : > { %v1954_v24 = vadd.f32 %v3658_v55, %v1819_v29  ;;  %v1318_v35 = vpop.f32.mrf.mxu0  ;;  %v1574_v40 = vpop.f32.mrf.mxu1 }
 0x169   : > { %v3858_v43 = vmax.f32 %v2145_v33, %v2079_v49  ;;  %v2018_v44 = vmax.f32 %v1890_v34, 0.0  ;;  %v1756_v31 = vmul.f32 %v3653_v53, %v1318_v35  ;;  %v1820_v45 = vmul.f32 %v3653_v53, %v1574_v40 }
 0x16a   : > { %v2082_v47 = vmax.f32 %v1954_v24, 0.0  ;;  %v1320_v41 = vpop.f32.mrf.mxu0  ;;  %v1576_v48 = vpop.f32.mrf.mxu1 }
 0x16b   : > { %v1891_v50 = vadd.f32 %v3658_v55, %v1756_v31  ;;  %v1955_v52 = vadd.f32 %v3658_v55, %v1820_v45 }
 0x16c   : > { %v2146_v60 = vmax.f32 %v2018_v44, %v2082_v47  ;;  %v1323_v56 = vpop.f32.mrf.mxu0  ;;  %v1579_v61 = vpop.f32.mrf.mxu1 }
 0x16d   : > { %v2019_v63 = vmax.f32 %v1891_v50, 0.0  ;;  %v2083_v0 = vmax.f32 %v1955_v52, 0.0  ;;  %v1757_v49 = vmul.f32 %v3653_v53, %v1323_v56  ;;  %v1821_v1 = vmul.f32 %v3653_v53, %v1579_v61 }
 0x16e   : > { %v3866_v59 = vmax.f32 %v2146_v60, %v2080_v2  ;;  %v1325_v3 = vpop.f32.mrf.mxu0  ;;  %v1581_v9 = vpop.f32.mrf.mxu1 }
 0x16f   : > { %v2147_v10 = vmax.f32 %v2019_v63, %v2083_v0  ;;  %v1892_v13 = vadd.f32 %v3658_v55, %v1757_v49  ;;  %v1956_v14 = vadd.f32 %v3658_v55, %v1821_v1 }
 0x170   : > { %v1326_v16 = vpop.f32.mrf.mxu0  ;;  %v1582_v17 = vpop.f32.mrf.mxu1 }
 0x171   : > { %v3870_v18 = vmax.f32 %v2147_v10, %v2081_v26  ;;  %v2020_v20 = vmax.f32 %v1892_v13, 0.0  ;;  %v2084_v27 = vmax.f32 %v1956_v14, 0.0  ;;  %v1758_v29 = vmul.f32 %v3653_v53, %v1326_v16 }
 0x172   : > { %v1822_v32 = vmul.f32 %v3653_v53, %v1582_v17  ;;  %v1328_v7 = vpop.f32.mrf.mxu0  ;;  %v1584_v2 = vpop.f32.mrf.mxu1 }
 0x173   : > { %v2148_v33 = vmax.f32 %v2020_v20, %v2084_v27  ;;  %v1893_v34 = vadd.f32 %v3658_v55, %v1758_v29 }
 0x174   : > { %v1957_v24 = vadd.f32 %v3658_v55, %v1822_v32  ;;  %v1331_v35 = vpop.f32.mrf.mxu0  ;;  %v1587_v40 = vpop.f32.mrf.mxu1 }
 0x175   : > { %v3876_v44 = vmax.f32 %v2148_v33, %v2082_v47  ;;  %v2021_v31 = vmax.f32 %v1893_v34, 0.0  ;;  %v1759_v26 = vmul.f32 %v3653_v53, %v1331_v35  ;;  %v1823_v45 = vmul.f32 %v3653_v53, %v1587_v40 }
 0x176   : > { %v2085_v41 = vmax.f32 %v1957_v24, 0.0  ;;  %v1333_v48 = vpop.f32.mrf.mxu0  ;;  %v1589_v50 = vpop.f32.mrf.mxu1 }
 0x177   : > { %v1894_v52 = vadd.f32 %v3658_v55, %v1759_v26  ;;  %v1958_v60 = vadd.f32 %v3658_v55, %v1823_v45 }
 0x178   : > { %v2149_v56 = vmax.f32 %v2021_v31, %v2085_v41  ;;  %v1334_v61 = vpop.f32.mrf.mxu0  ;;  %v1590_v63 = vpop.f32.mrf.mxu1 }
 0x179   : > { %v2022_v49 = vmax.f32 %v1894_v52, 0.0  ;;  %v2086_v1 = vmax.f32 %v1958_v60, 0.0  ;;  %v1760_v47 = vmul.f32 %v3653_v53, %v1334_v61  ;;  %v1824_v3 = vmul.f32 %v3653_v53, %v1590_v63 }
 0x17a   : > { %v3884_v9 = vmax.f32 %v2149_v56, %v2083_v0  ;;  %v1336_v10 = vpop.f32.mrf.mxu0  ;;  %v1592_v13 = vpop.f32.mrf.mxu1 }
 0x17b   : > { %v2150_v14 = vmax.f32 %v2022_v49, %v2086_v1  ;;  %v1895_v16 = vadd.f32 %v3658_v55, %v1760_v47  ;;  %v1959_v17 = vadd.f32 %v3658_v55, %v1824_v3 }
 0x17c   : > { %v1339_v20 = vpop.f32.mrf.mxu0  ;;  %v1595_v29 = vpop.f32.mrf.mxu1 }
 0x17d   : > { %v3888_v32 = vmax.f32 %v2150_v14, %v2084_v27  ;;  %v2023_v7 = vmax.f32 %v1895_v16, 0.0  ;;  %v2087_v2 = vmax.f32 %v1959_v17, 0.0  ;;  %v1761_v33 = vmul.f32 %v3653_v53, %v1339_v20 }
 0x17e   : > { %v1825_v34 = vmul.f32 %v3653_v53, %v1595_v29  ;;  %v1341_v24 = vpop.f32.mrf.mxu0  ;;  %v1597_v0 = vpop.f32.mrf.mxu1 }
 0x17f   : > { %v2151_v35 = vmax.f32 %v2023_v7, %v2087_v2  ;;  %v1896_v40 = vadd.f32 %v3658_v55, %v1761_v33  ;;  %v2152_v33 = vmax.f32 %v3672_v11, 0.0 }
 0x180   : > { %v1960_v31 = vadd.f32 %v3658_v55, %v1825_v34  ;;  %v1342_v26 = vpop.f32.mrf.mxu0  ;;  %v1598_v45 = vpop.f32.mrf.mxu1  ;;  %v2153_v34 = vmax.f32 %v3680_v22, 0.0 }
 0x181   : > { %v3894_v48 = vmax.f32 %v2151_v35, %v2085_v41  ;;  %v2024_v50 = vmax.f32 %v1896_v40, 0.0  ;;  %v1762_v27 = vmul.f32 %v3653_v53, %v1342_v26  ;;  %v1826_v52 = vmul.f32 %v3653_v53, %v1598_v45 }
 0x182   : > { %v2088_v60 = vmax.f32 %v1960_v31, 0.0  ;;  %v1344_v56 = vpop.f32.mrf.mxu0  ;;  %v1600_v61 = vpop.f32.mrf.mxu1 }
 0x183   : > { %v1897_v63 = vadd.f32 %v3658_v55, %v1762_v27  ;;  %v1961_v49 = vadd.f32 %v3658_v55, %v1826_v52 }
 0x184   : > { %v2184_v1 = vmax.f32 %v2024_v50, %v2088_v60  ;;  %v1347_v47 = vpop.f32.mrf.mxu0  ;;  %v1603_v3 = vpop.f32.mrf.mxu1 }
 0x185   : > { %v2025_v10 = vmax.f32 %v1897_v63, 0.0  ;;  %v2089_v13 = vmax.f32 %v1961_v49, 0.0  ;;  %v1763_v41 = vmul.f32 %v3653_v53, %v1347_v47  ;;  %v1827_v14 = vmul.f32 %v3653_v53, %v1603_v3 }
 0x186   : > { %v2216_v16 = vmax.f32 %v2184_v1, 0.0  ;;  %v1349_v17 = vpop.f32.mrf.mxu0  ;;  %v1605_v20 = vpop.f32.mrf.mxu1 }
 0x187   : > { %v2185_v29 = vmax.f32 %v2025_v10, %v2089_v13  ;;  %v1898_v7 = vadd.f32 %v3658_v55, %v1763_v41  ;;  %v1962_v2 = vadd.f32 %v3658_v55, %v1827_v14 }
 0x188   : > { %v2312_v24 = vrot.slane %v2216_v16, 7  ;;  %v1350_v0 = vpop.f32.mrf.mxu0  ;;  %v1606_v35 = vpop.f32.mrf.mxu1  ;;  %v2248_v50 = vmax.f32 %v2152_v33, %v2216_v16 }
 0x189   : > { %v2217_v40 = vmax.f32 %v2185_v29, 0.0  ;;  %v2026_v31 = vmax.f32 %v1898_v7, 0.0  ;;  %v2090_v26 = vmax.f32 %v1962_v2, 0.0  ;;  %v1764_v45 = vmul.f32 %v3653_v53, %v1350_v0 }
 0x18a   : > { %v1828_v27 = vmul.f32 %v3653_v53, %v1606_v35  ;;  %v1352_v52 = vpop.f32.mrf.mxu0  ;;  %v1608_v56 = vpop.f32.mrf.mxu1  ;;  %v2392_v61 = vsel %vm1170_vm1, 0.0, %v2312_v24 }
 0x18b   : > { %v2249_v11 = vmax.f32 %v2153_v34, %v2217_v40  ;;  %v2313_v63 = vrot.slane %v2217_v40, 7  ;;  %v2186_v22 = vmax.f32 %v2026_v31, %v2090_v26  ;;  %v1899_v49 = vadd.f32 %v3658_v55, %v1764_v45 }
 0x18c   : > { %v1963_v1 = vadd.f32 %v3658_v55, %v1828_v27  ;;  %v1355_v47 = vpop.f32.mrf.mxu0  ;;  %v1611_v3 = vpop.f32.mrf.mxu1  ;;  %v2408_v17 = vmax.f32 %v2248_v50, %v2392_v61 }
 0x18d   : > { %v2314_v10 = vsel %vm1170_vm1, %v2312_v24, %v2313_v63  ;;  %v2218_v41 = vmax.f32 %v2186_v22, %v2088_v60  ;;  %v1765_v14 = vmul.f32 %v3653_v53, %v1355_v47  ;;  %v1829_v16 = vmul.f32 %v3653_v53, %v1611_v3  ;;  %v3925_v53 = vld [vmem:[%s4171_s2] ss:$0 sm:$0xff] }
 0x18e   : > { %v2409_v20 = vmax.f32 %v2249_v11, %v2314_v10  ;;  %v2027_v29 = vmax.f32 %v1899_v49, 0.0  ;;  %v2091_v7 = vmax.f32 %v1963_v1, 0.0  ;;  %v1357_v2 = vpop.f32.mrf.mxu0  ;;  %v1613_v33 = vpop.f32.mrf.mxu1  ;;  %v3936_v22 = vld [vmem:[%s4172_s3] ss:$0 sm:$0xff] }
 0x18f   : > { %v1900_v34 = vadd.f32 %v3658_v55, %v1765_v14  ;;  %v3919_v0 = vadd.f32 %v3658_v55, %v1829_v16  ;;  %v2315_v40 = vrot.slane %v2218_v41, 7  ;;  %v2250_v11 = vmax.f32 %v3696_v46, %v2218_v41 }
 0x190   : > { %v2961_v35 = vpack.c.bf16 %v2409_v20, %v2408_v17  ;;  %v2187_v31 = vmax.f32 %v2027_v29, %v2091_v7  ;;  %v1358_v24 = vpop.f32.mrf.mxu0  ;;  %v1614_v60 = vpop.f32.mrf.mxu1 }
 0x191   : > { %v2028_v45 = vmax.f32 %v1900_v34, 0.0  ;;  %v2092_v27 = vmax.f32 %v3919_v0, 0.0  ;;  %v1766_v50 = vmul.f32 %v3925_v53, %v1358_v24  ;;  %v1830_v52 = vmul.f32 %v3925_v53, %v1614_v60 }
 0x192   : > { %2962 = vst [vmem:[%s3928_s23] sm:$0xff] %v2961_v35   ;;  %v2219_v55 = vmax.f32 %v2187_v31, %v2089_v13  ;;  %v1360_v56 = vpop.f32.mrf.mxu0  ;;  %v1616_v61 = vpop.f32.mrf.mxu1  ;;  %v2393_v1 = vsel %vm1170_vm1, 0.0, %v2315_v40 }
 0x193   : > { %v2188_v63 = vmax.f32 %v2028_v45, %v2092_v27  ;;  %v1901_v49 = vadd.f32 %v3936_v22, %v1766_v50  ;;  %v1965_v13 = vadd.f32 %v3936_v22, %v1830_v52  ;;  %v2410_v34 = vmax.f32 %v2250_v11, %v2393_v1 }
 0x194   : > { %v2251_v47 = vmax.f32 %v3702_v58, %v2219_v55  ;;  %v2316_v3 = vrot.slane %v2219_v55, 7  ;;  %v1363_v10 = vpop.f32.mrf.mxu0  ;;  %v1619_v14 = vpop.f32.mrf.mxu1 }
 0x195   : > { %v2220_v16 = vmax.f32 %v2188_v63, %v2090_v26  ;;  %v2029_v17 = vmax.f32 %v1901_v49, 0.0  ;;  %v1767_v46 = vmul.f32 %v3925_v53, %v1363_v10  ;;  %v1831_v41 = vmul.f32 %v3925_v53, %v1619_v14 }
 0x196   : > { %v2317_v20 = vsel %vm1170_vm1, %v2315_v40, %v2316_v3  ;;  %v2093_v29 = vmax.f32 %v1965_v13, 0.0  ;;  %v1365_v2 = vpop.f32.mrf.mxu0  ;;  %v1621_v33 = vpop.f32.mrf.mxu1 }
 0x197   : > { %v2411_v0 = vmax.f32 %v2251_v47, %v2317_v20  ;;  %v2318_v58 = vrot.slane %v2220_v16, 7  ;;  %v1902_v35 = vadd.f32 %v3936_v22, %v1767_v46  ;;  %v1966_v24 = vadd.f32 %v3936_v22, %v1831_v41 }
 0x198   : > { %v2189_v31 = vmax.f32 %v2029_v17, %v2093_v29  ;;  %v1366_v26 = vpop.f32.mrf.mxu0  ;;  %v1622_v60 = vpop.f32.mrf.mxu1  ;;  %v2252_v63 = vmax.f32 %v3710_v8, %v2220_v16 }
 0x199   : > { %v2966_v45 = vpack.c.bf16 %v2411_v0, %v2410_v34  ;;  %v2030_v50 = vmax.f32 %v1902_v35, 0.0  ;;  %v1768_v55 = vmul.f32 %v3925_v53, %v1366_v26  ;;  %v2094_v40 = vmax.f32 %v1966_v24, 0.0 }
 0x19a   : > { %v2221_v52 = vmax.f32 %v2189_v31, %v2091_v7  ;;  %v1832_v56 = vmul.f32 %v3925_v53, %v1622_v60  ;;  %v1368_v61 = vpop.f32.mrf.mxu0  ;;  %v1624_v11 = vpop.f32.mrf.mxu1  ;;  %v2394_v49 = vsel %vm1170_vm1, 0.0, %v2318_v58 }
 0x19b   : > { %3038 = vst [vmem:[%s3928_s23 + $0x8] sm:$0xff] %v2966_v45   ;;  %v1903_v1 = vadd.f32 %v3936_v22, %v1768_v55  ;;  %v2190_v13 = vmax.f32 %v2030_v50, %v2094_v40  ;;  %v2412_v34 = vmax.f32 %v2252_v63, %v2394_v49 }
 0x19c   : > { %v2253_v47 = vmax.f32 %v3724_v30, %v2221_v52  ;;  %v2319_v3 = vrot.slane %v2221_v52, 7  ;;  %v1967_v10 = vadd.f32 %v3936_v22, %v1832_v56  ;;  %v1371_v14 = vpop.f32.mrf.mxu0  ;;  %v1627_v7 = vpop.f32.mrf.mxu1 }
 0x19d   : > { %v2031_v17 = vmax.f32 %v1903_v1, 0.0  ;;  %v1769_v46 = vmul.f32 %v3925_v53, %v1371_v14  ;;  %v1833_v41 = vmul.f32 %v3925_v53, %v1627_v7  ;;  %v2222_v8 = vmax.f32 %v2190_v13, %v2092_v27 }
 0x19e   : > { %v2320_v20 = vsel %vm1170_vm1, %v2318_v58, %v2319_v3  ;;  %v2095_v16 = vmax.f32 %v1967_v10, 0.0  ;;  %v1373_v2 = vpop.f32.mrf.mxu0  ;;  %v1629_v33 = vpop.f32.mrf.mxu1 }
 0x19f   : > { %v2413_v30 = vmax.f32 %v2253_v47, %v2320_v20  ;;  %v1904_v0 = vadd.f32 %v3936_v22, %v1769_v46  ;;  %v1968_v35 = vadd.f32 %v3936_v22, %v1833_v41  ;;  %v2321_v31 = vrot.slane %v2222_v8, 7 }
 0x1a0   : > { %v2191_v24 = vmax.f32 %v2031_v17, %v2095_v16  ;;  %v1374_v26 = vpop.f32.mrf.mxu0  ;;  %v1630_v60 = vpop.f32.mrf.mxu1  ;;  %v2254_v11 = vmax.f32 %v3728_v38, %v2222_v8 }
 0x1a1   : > { %v2971_v45 = vpack.c.bf16 %v2413_v30, %v2412_v34  ;;  %v2032_v50 = vmax.f32 %v1904_v0, 0.0  ;;  %v2096_v55 = vmax.f32 %v1968_v35, 0.0  ;;  %v1770_v58 = vmul.f32 %v3925_v53, %v1374_v26 }
 0x1a2   : > { %v2223_v27 = vmax.f32 %v2191_v24, %v2093_v29  ;;  %v1834_v52 = vmul.f32 %v3925_v53, %v1630_v60  ;;  %v1376_v56 = vpop.f32.mrf.mxu0  ;;  %v1632_v61 = vpop.f32.mrf.mxu1  ;;  %v2395_v1 = vsel %vm1170_vm1, 0.0, %v2321_v31 }
 0x1a3   : > { %3039 = vst [vmem:[%s3928_s23 + $0x10] sm:$0xff] %v2971_v45   ;;  %v2192_v63 = vmax.f32 %v2032_v50, %v2096_v55  ;;  %v1905_v49 = vadd.f32 %v3936_v22, %v1770_v58  ;;  %v2414_v2 = vmax.f32 %v2254_v11, %v2395_v1 }
 0x1a4   : > { %v2255_v47 = vmax.f32 %v3738_v54, %v2223_v27  ;;  %v2322_v3 = vrot.slane %v2223_v27, 7  ;;  %v1969_v13 = vadd.f32 %v3936_v22, %v1834_v52  ;;  %v1379_v10 = vpop.f32.mrf.mxu0  ;;  %v1635_v14 = vpop.f32.mrf.mxu1 }
 0x1a5   : > { %v2224_v29 = vmax.f32 %v2192_v63, %v2094_v40  ;;  %v2033_v7 = vmax.f32 %v1905_v49, 0.0  ;;  %v1771_v17 = vmul.f32 %v3925_v53, %v1379_v10  ;;  %v1835_v46 = vmul.f32 %v3925_v53, %v1635_v14 }
 0x1a6   : > { %v2323_v38 = vsel %vm1170_vm1, %v2321_v31, %v2322_v3  ;;  %v2097_v41 = vmax.f32 %v1969_v13, 0.0  ;;  %v1381_v20 = vpop.f32.mrf.mxu0  ;;  %v1637_v8 = vpop.f32.mrf.mxu1 }
 0x1a7   : > { %v2415_v33 = vmax.f32 %v2255_v47, %v2323_v38  ;;  %v2324_v54 = vrot.slane %v2224_v29, 7  ;;  %v1906_v34 = vadd.f32 %v3936_v22, %v1771_v17  ;;  %v1970_v0 = vadd.f32 %v3936_v22, %v1835_v46 }
 0x1a8   : > { %v2193_v30 = vmax.f32 %v2033_v7, %v2097_v41  ;;  %v1382_v40 = vpop.f32.mrf.mxu0  ;;  %v1638_v35 = vpop.f32.mrf.mxu1  ;;  %v2256_v52 = vmax.f32 %v3750_v12, %v2224_v29 }
 0x1a9   : > { %v2976_v24 = vpack.c.bf16 %v2415_v33, %v2414_v2  ;;  %v2034_v26 = vmax.f32 %v1906_v34, 0.0  ;;  %v1772_v60 = vmul.f32 %v3925_v53, %v1382_v40  ;;  %v2098_v31 = vmax.f32 %v1970_v0, 0.0 }
 0x1aa   : > { %v2225_v45 = vmax.f32 %v2193_v30, %v2095_v16  ;;  %v1836_v50 = vmul.f32 %v3925_v53, %v1638_v35  ;;  %v1384_v58 = vpop.f32.mrf.mxu0  ;;  %v1640_v27 = vpop.f32.mrf.mxu1  ;;  %v2396_v56 = vsel %vm1170_vm1, 0.0, %v2324_v54 }
 0x1ab   : > { %3040 = vst [vmem:[%s3928_s23 + $0x18] sm:$0xff] %v2976_v24   ;;  %v1907_v61 = vadd.f32 %v3936_v22, %v1772_v60  ;;  %v2194_v49 = vmax.f32 %v2034_v26, %v2098_v31  ;;  %v2416_v46 = vmax.f32 %v2256_v52, %v2396_v56 }
 0x1ac   : > { %v2257_v11 = vmax.f32 %v3756_v23, %v2225_v45  ;;  %v2325_v63 = vrot.slane %v2225_v45, 7  ;;  %v1971_v1 = vadd.f32 %v3936_v22, %v1836_v50  ;;  %v1387_v47 = vpop.f32.mrf.mxu0  ;;  %v1643_v16 = vpop.f32.mrf.mxu1 }
 0x1ad   : > { %v2035_v3 = vmax.f32 %v1907_v61, 0.0  ;;  %v1773_v13 = vmul.f32 %v3925_v53, %v1387_v47  ;;  %v1837_v10 = vmul.f32 %v3925_v53, %v1643_v16  ;;  %v2226_v12 = vmax.f32 %v2194_v49, %v2096_v55 }
 0x1ae   : > { %v2326_v14 = vsel %vm1170_vm1, %v2324_v54, %v2325_v63  ;;  %v2099_v29 = vmax.f32 %v1971_v1, 0.0  ;;  %v1389_v7 = vpop.f32.mrf.mxu0  ;;  %v1645_v17 = vpop.f32.mrf.mxu1 }
 0x1af   : > { %v2417_v23 = vmax.f32 %v2257_v11, %v2326_v14  ;;  %v1908_v38 = vadd.f32 %v3936_v22, %v1773_v13  ;;  %v1972_v20 = vadd.f32 %v3936_v22, %v1837_v10  ;;  %v2327_v8 = vrot.slane %v2226_v12, 7 }
 0x1b0   : > { %v2195_v2 = vmax.f32 %v2035_v3, %v2099_v29  ;;  %v1390_v33 = vpop.f32.mrf.mxu0  ;;  %v1646_v34 = vpop.f32.mrf.mxu1  ;;  %v2258_v60 = vmax.f32 %v3764_v39, %v2226_v12 }
 0x1b1   : > { %v2981_v30 = vpack.c.bf16 %v2417_v23, %v2416_v46  ;;  %v2036_v0 = vmax.f32 %v1908_v38, 0.0  ;;  %v2100_v40 = vmax.f32 %v1972_v20, 0.0  ;;  %v1774_v54 = vmul.f32 %v3925_v53, %v1390_v33 }
 0x1b2   : > { %v2227_v55 = vmax.f32 %v2195_v2, %v2097_v41  ;;  %v1838_v35 = vmul.f32 %v3925_v53, %v1646_v34  ;;  %v1392_v24 = vpop.f32.mrf.mxu0  ;;  %v1648_v26 = vpop.f32.mrf.mxu1  ;;  %v2397_v58 = vsel %vm1170_vm1, 0.0, %v2327_v8 }
 0x1b3   : > { %3041 = vst [vmem:[%s3928_s23 + $0x20] sm:$0xff] %v2981_v30   ;;  %v2196_v45 = vmax.f32 %v2036_v0, %v2100_v40  ;;  %v1909_v50 = vadd.f32 %v3936_v22, %v1774_v54  ;;  %v2418_v13 = vmax.f32 %v2258_v60, %v2397_v58 }
 0x1b4   : > { %v2259_v27 = vmax.f32 %v3776_v62, %v2227_v55  ;;  %v2328_v52 = vrot.slane %v2227_v55, 7  ;;  %v1973_v56 = vadd.f32 %v3936_v22, %v1838_v35  ;;  %v1395_v61 = vpop.f32.mrf.mxu0  ;;  %v1651_v11 = vpop.f32.mrf.mxu1 }
 0x1b5   : > { %v2228_v41 = vmax.f32 %v2196_v45, %v2098_v31  ;;  %v2037_v63 = vmax.f32 %v1909_v50, 0.0  ;;  %v1775_v49 = vmul.f32 %v3925_v53, %v1395_v61  ;;  %v1839_v1 = vmul.f32 %v3925_v53, %v1651_v11 }
 0x1b6   : > { %v2329_v39 = vsel %vm1170_vm1, %v2327_v8, %v2328_v52  ;;  %v2101_v47 = vmax.f32 %v1973_v56, 0.0  ;;  %v1397_v16 = vpop.f32.mrf.mxu0  ;;  %v1653_v3 = vpop.f32.mrf.mxu1 }
 0x1b7   : > { %v2419_v10 = vmax.f32 %v2259_v27, %v2329_v39  ;;  %v2330_v62 = vrot.slane %v2228_v41, 7  ;;  %v1910_v14 = vadd.f32 %v3936_v22, %v1775_v49  ;;  %v1974_v7 = vadd.f32 %v3936_v22, %v1839_v1 }
 0x1b8   : > { %v2197_v12 = vmax.f32 %v2037_v63, %v2101_v47  ;;  %v1398_v31 = vpop.f32.mrf.mxu0  ;;  %v1654_v17 = vpop.f32.mrf.mxu1  ;;  %v2260_v30 = vmax.f32 %v3780_v6, %v2228_v41 }
 0x1b9   : > { %v2986_v46 = vpack.c.bf16 %v2419_v10, %v2418_v13  ;;  %v2038_v23 = vmax.f32 %v1910_v14, 0.0  ;;  %v1776_v38 = vmul.f32 %v3925_v53, %v1398_v31  ;;  %v2102_v8 = vmax.f32 %v1974_v7, 0.0 }
 0x1ba   : > { %v2229_v20 = vmax.f32 %v2197_v12, %v2099_v29  ;;  %v1840_v2 = vmul.f32 %v3925_v53, %v1654_v17  ;;  %v1400_v33 = vpop.f32.mrf.mxu0  ;;  %v1656_v34 = vpop.f32.mrf.mxu1  ;;  %v2398_v0 = vsel %vm1170_vm1, 0.0, %v2330_v62 }
 0x1bb   : > { %3042 = vst [vmem:[%s3928_s23 + $0x28] sm:$0xff] %v2986_v46   ;;  %v1911_v54 = vadd.f32 %v3936_v22, %v1776_v38  ;;  %v2198_v24 = vmax.f32 %v2038_v23, %v2102_v8  ;;  %v2420_v11 = vmax.f32 %v2260_v30, %v2398_v0 }
 0x1bc   : > { %v2261_v55 = vmax.f32 %v3786_v21, %v2229_v20  ;;  %v2331_v35 = vrot.slane %v2229_v20, 7  ;;  %v1975_v26 = vadd.f32 %v3936_v22, %v1840_v2  ;;  %v1403_v60 = vpop.f32.mrf.mxu0  ;;  %v1659_v29 = vpop.f32.mrf.mxu1 }
 0x1bd   : > { %v2039_v45 = vmax.f32 %v1911_v54, 0.0  ;;  %v1777_v50 = vmul.f32 %v3925_v53, %v1403_v60  ;;  %v1841_v58 = vmul.f32 %v3925_v53, %v1659_v29  ;;  %v2230_v6 = vmax.f32 %v2198_v24, %v2100_v40 }
 0x1be   : > { %v2332_v27 = vsel %vm1170_vm1, %v2330_v62, %v2331_v35  ;;  %v2103_v52 = vmax.f32 %v1975_v26, 0.0  ;;  %v1405_v56 = vpop.f32.mrf.mxu0  ;;  %v1661_v61 = vpop.f32.mrf.mxu1 }
 0x1bf   : > { %v2421_v21 = vmax.f32 %v2261_v55, %v2332_v27  ;;  %v1912_v41 = vadd.f32 %v3936_v22, %v1777_v50  ;;  %v1976_v63 = vadd.f32 %v3936_v22, %v1841_v58  ;;  %v2333_v49 = vrot.slane %v2230_v6, 7 }
 0x1c0   : > { %v2199_v1 = vmax.f32 %v2039_v45, %v2103_v52  ;;  %v1406_v39 = vpop.f32.mrf.mxu0  ;;  %v1662_v16 = vpop.f32.mrf.mxu1  ;;  %v2262_v31 = vmax.f32 %v3794_v42, %v2230_v6 }
 0x1c1   : > { %v2991_v3 = vpack.c.bf16 %v2421_v21, %v2420_v11  ;;  %v2040_v13 = vmax.f32 %v1912_v41, 0.0  ;;  %v2104_v10 = vmax.f32 %v1976_v63, 0.0  ;;  %v1778_v62 = vmul.f32 %v3925_v53, %v1406_v39 }
 0x1c2   : > { %v2231_v40 = vmax.f32 %v2199_v1, %v2101_v47  ;;  %v1842_v14 = vmul.f32 %v3925_v53, %v1662_v16  ;;  %v1408_v12 = vpop.f32.mrf.mxu0  ;;  %v1664_v7 = vpop.f32.mrf.mxu1  ;;  %v2399_v23 = vsel %vm1170_vm1, 0.0, %v2333_v49 }
 0x1c3   : > { %3043 = vst [vmem:[%s3928_s23 + $0x30] sm:$0xff] %v2991_v3   ;;  %v2200_v17 = vmax.f32 %v2040_v13, %v2104_v10  ;;  %v1913_v46 = vadd.f32 %v3936_v22, %v1778_v62  ;;  %v2422_v26 = vmax.f32 %v2262_v31, %v2399_v23 }
 0x1c4   : > { %v2263_v38 = vmax.f32 %v3798_v51, %v2231_v40  ;;  %v2334_v20 = vrot.slane %v2231_v40, 7  ;;  %v1977_v2 = vadd.f32 %v3936_v22, %v1842_v14  ;;  %v1411_v33 = vpop.f32.mrf.mxu0  ;;  %v1667_v34 = vpop.f32.mrf.mxu1 }
 0x1c5   : > { %v2232_v47 = vmax.f32 %v2200_v17, %v2102_v8  ;;  %v2041_v30 = vmax.f32 %v1913_v46, 0.0  ;;  %v1779_v0 = vmul.f32 %v3925_v53, %v1411_v33  ;;  %v1843_v54 = vmul.f32 %v3925_v53, %v1667_v34 }
 0x1c6   : > { %v2335_v42 = vsel %vm1170_vm1, %v2333_v49, %v2334_v20  ;;  %v2105_v55 = vmax.f32 %v1977_v2, 0.0  ;;  %v1413_v35 = vpop.f32.mrf.mxu0  ;;  %v1669_v24 = vpop.f32.mrf.mxu1 }
 0x1c7   : > { %v2423_v60 = vmax.f32 %v2263_v38, %v2335_v42  ;;  %v2336_v51 = vrot.slane %v2232_v47, 7  ;;  %v1914_v29 = vadd.f32 %v3936_v22, %v1779_v0  ;;  %v1978_v50 = vadd.f32 %v3936_v22, %v1843_v54 }
 0x1c8   : > { %v2201_v45 = vmax.f32 %v2041_v30, %v2105_v55  ;;  %v1414_v8 = vpop.f32.mrf.mxu0  ;;  %v1670_v58 = vpop.f32.mrf.mxu1  ;;  %v2264_v49 = vmax.f32 %v3804_v4, %v2232_v47 }
 0x1c9   : > { %v2996_v27 = vpack.c.bf16 %v2423_v60, %v2422_v26  ;;  %v2042_v6 = vmax.f32 %v1914_v29, 0.0  ;;  %v1780_v56 = vmul.f32 %v3925_v53, %v1414_v8  ;;  %v2106_v11 = vmax.f32 %v1978_v50, 0.0 }
 0x1ca   : > { %v2233_v61 = vmax.f32 %v2201_v45, %v2103_v52  ;;  %v1844_v21 = vmul.f32 %v3925_v53, %v1670_v58  ;;  %v1416_v41 = vpop.f32.mrf.mxu0  ;;  %v1672_v63 = vpop.f32.mrf.mxu1  ;;  %v2400_v1 = vsel %vm1170_vm1, 0.0, %v2336_v51 }
 0x1cb   : > { %3044 = vst [vmem:[%s3928_s23 + $0x38] sm:$0xff] %v2996_v27   ;;  %v1915_v39 = vadd.f32 %v3936_v22, %v1780_v56  ;;  %v2202_v13 = vmax.f32 %v2042_v6, %v2106_v11  ;;  %v2424_v38 = vmax.f32 %v2264_v49, %v2400_v1 }
 0x1cc   : > { %v2265_v16 = vmax.f32 %v3812_v28, %v2233_v61  ;;  %v2337_v3 = vrot.slane %v2233_v61, 7  ;;  %v1979_v62 = vadd.f32 %v3936_v22, %v1844_v21  ;;  %v1419_v40 = vpop.f32.mrf.mxu0  ;;  %v1675_v52 = vpop.f32.mrf.mxu1 }
 0x1cd   : > { %v2043_v14 = vmax.f32 %v1915_v39, 0.0  ;;  %v1781_v12 = vmul.f32 %v3925_v53, %v1419_v40  ;;  %v1845_v7 = vmul.f32 %v3925_v53, %v1675_v52  ;;  %v2234_v4 = vmax.f32 %v2202_v13, %v2104_v10 }
 0x1ce   : > { %v2338_v31 = vsel %vm1170_vm1, %v2336_v51, %v2337_v3  ;;  %v2107_v17 = vmax.f32 %v1979_v62, 0.0  ;;  %v1421_v46 = vpop.f32.mrf.mxu0  ;;  %v1677_v23 = vpop.f32.mrf.mxu1 }
 0x1cf   : > { %v2425_v28 = vmax.f32 %v2265_v16, %v2338_v31  ;;  %v1916_v20 = vadd.f32 %v3936_v22, %v1781_v12  ;;  %v1980_v2 = vadd.f32 %v3936_v22, %v1845_v7  ;;  %v2339_v33 = vrot.slane %v2234_v4, 7 }
 0x1d0   : > { %v2203_v34 = vmax.f32 %v2043_v14, %v2107_v17  ;;  %v1422_v47 = vpop.f32.mrf.mxu0  ;;  %v1678_v30 = vpop.f32.mrf.mxu1  ;;  %v2266_v51 = vmax.f32 %v3816_v36, %v2234_v4 }
 0x1d1   : > { %v3001_v0 = vpack.c.bf16 %v2425_v28, %v2424_v38  ;;  %v2044_v54 = vmax.f32 %v1916_v20, 0.0  ;;  %v2108_v42 = vmax.f32 %v1980_v2, 0.0  ;;  %v1782_v35 = vmul.f32 %v3925_v53, %v1422_v47 }
 0x1d2   : > { %v2235_v10 = vmax.f32 %v2203_v34, %v2105_v55  ;;  %v1846_v24 = vmul.f32 %v3925_v53, %v1678_v30  ;;  %v1424_v26 = vpop.f32.mrf.mxu0  ;;  %v1680_v60 = vpop.f32.mrf.mxu1  ;;  %v2401_v50 = vsel %vm1170_vm1, 0.0, %v2339_v33 }
 0x1d3   : > { %3045 = vst [vmem:[%s3928_s23 + $0x40] sm:$0xff] %v3001_v0   ;;  %v2204_v29 = vmax.f32 %v2044_v54, %v2108_v42  ;;  %v1917_v45 = vadd.f32 %v3936_v22, %v1782_v35  ;;  %v2426_v39 = vmax.f32 %v2266_v51, %v2401_v50 }
 0x1d4   : > { %v2267_v8 = vmax.f32 %v3822_v57, %v2235_v10  ;;  %v2340_v58 = vrot.slane %v2235_v10, 7  ;;  %v1981_v27 = vadd.f32 %v3936_v22, %v1846_v24  ;;  %v1427_v6 = vpop.f32.mrf.mxu0  ;;  %v1683_v56 = vpop.f32.mrf.mxu1 }
 0x1d5   : > { %v2236_v55 = vmax.f32 %v2204_v29, %v2106_v11  ;;  %v2045_v61 = vmax.f32 %v1917_v45, 0.0  ;;  %v1783_v21 = vmul.f32 %v3925_v53, %v1427_v6  ;;  %v1847_v41 = vmul.f32 %v3925_v53, %v1683_v56 }
 0x1d6   : > { %v2341_v36 = vsel %vm1170_vm1, %v2339_v33, %v2340_v58  ;;  %v2109_v63 = vmax.f32 %v1981_v27, 0.0  ;;  %v1429_v49 = vpop.f32.mrf.mxu0  ;;  %v1685_v1 = vpop.f32.mrf.mxu1 }
 0x1d7   : > { %v2427_v16 = vmax.f32 %v2267_v8, %v2341_v36  ;;  %v2342_v57 = vrot.slane %v2236_v55, 7  ;;  %v1918_v3 = vadd.f32 %v3936_v22, %v1783_v21  ;;  %v1982_v62 = vadd.f32 %v3936_v22, %v1847_v41 }
 0x1d8   : > { %v2205_v13 = vmax.f32 %v2045_v61, %v2109_v63  ;;  %v1430_v11 = vpop.f32.mrf.mxu0  ;;  %v1686_v40 = vpop.f32.mrf.mxu1  ;;  %v2268_v38 = vmax.f32 %v3830_v15, %v2236_v55 }
 0x1d9   : > { %v3006_v52 = vpack.c.bf16 %v2427_v16, %v2426_v39  ;;  %v2046_v14 = vmax.f32 %v1918_v3, 0.0  ;;  %v1784_v12 = vmul.f32 %v3925_v53, %v1430_v11  ;;  %v2110_v31 = vmax.f32 %v1982_v62, 0.0 }
 0x1da   : > { %v2237_v7 = vmax.f32 %v2205_v13, %v2107_v17  ;;  %v1848_v4 = vmul.f32 %v3925_v53, %v1686_v40  ;;  %v1432_v46 = vpop.f32.mrf.mxu0  ;;  %v1688_v23 = vpop.f32.mrf.mxu1  ;;  %v2402_v28 = vsel %vm1170_vm1, 0.0, %v2342_v57 }
 0x1db   : > { %3046 = vst [vmem:[%s3928_s23 + $0x48] sm:$0xff] %v3006_v52   ;;  %v1919_v20 = vadd.f32 %v3936_v22, %v1784_v12  ;;  %v2206_v34 = vmax.f32 %v2046_v14, %v2110_v31  ;;  %v2428_v51 = vmax.f32 %v2268_v38, %v2402_v28 }
 0x1dc   : > { %v2269_v2 = vmax.f32 %v3834_v25, %v2237_v7  ;;  %v2343_v33 = vrot.slane %v2237_v7, 7  ;;  %v1983_v47 = vadd.f32 %v3936_v22, %v1848_v4  ;;  %v1435_v30 = vpop.f32.mrf.mxu0  ;;  %v1691_v17 = vpop.f32.mrf.mxu1 }
 0x1dd   : > { %v2047_v0 = vmax.f32 %v1919_v20, 0.0  ;;  %v1785_v54 = vmul.f32 %v3925_v53, %v1435_v30  ;;  %v1849_v35 = vmul.f32 %v3925_v53, %v1691_v17  ;;  %v2238_v15 = vmax.f32 %v2206_v34, %v2108_v42 }
 0x1de   : > { %v2344_v10 = vsel %vm1170_vm1, %v2342_v57, %v2343_v33  ;;  %v2111_v24 = vmax.f32 %v1983_v47, 0.0  ;;  %v1437_v26 = vpop.f32.mrf.mxu0  ;;  %v1693_v60 = vpop.f32.mrf.mxu1 }
 0x1df   : > { %v2429_v25 = vmax.f32 %v2269_v2, %v2344_v10  ;;  %v1920_v29 = vadd.f32 %v3936_v22, %v1785_v54  ;;  %v1984_v45 = vadd.f32 %v3936_v22, %v1849_v35  ;;  %v2345_v50 = vrot.slane %v2238_v15, 7 }
 0x1e0   : > { %v2207_v8 = vmax.f32 %v2047_v0, %v2111_v24  ;;  %v1438_v58 = vpop.f32.mrf.mxu0  ;;  %v1694_v27 = vpop.f32.mrf.mxu1  ;;  %v2270_v49 = vmax.f32 %v3840_v37, %v2238_v15 }
 0x1e1   : > { %v3011_v6 = vpack.c.bf16 %v2429_v25, %v2428_v51  ;;  %v2048_v56 = vmax.f32 %v1920_v29, 0.0  ;;  %v2112_v55 = vmax.f32 %v1984_v45, 0.0  ;;  %v1786_v61 = vmul.f32 %v3925_v53, %v1438_v58 }
 0x1e2   : > { %v2239_v42 = vmax.f32 %v2207_v8, %v2109_v63  ;;  %v1850_v21 = vmul.f32 %v3925_v53, %v1694_v27  ;;  %v1440_v41 = vpop.f32.mrf.mxu0  ;;  %v1696_v36 = vpop.f32.mrf.mxu1  ;;  %v2403_v16 = vsel %vm1170_vm1, 0.0, %v2345_v50 }
 0x1e3   : > { %3047 = vst [vmem:[%s3928_s23 + $0x50] sm:$0xff] %v3011_v6   ;;  %v2208_v1 = vmax.f32 %v2048_v56, %v2112_v55  ;;  %v1921_v39 = vadd.f32 %v3936_v22, %v1786_v61  ;;  %v2430_v46 = vmax.f32 %v2270_v49, %v2403_v16 }
 0x1e4   : > { %v2271_v57 = vmax.f32 %v3848_v5, %v2239_v42  ;;  %v2346_v3 = vrot.slane %v2239_v42, 7  ;;  %v1985_v13 = vadd.f32 %v3936_v22, %v1850_v21  ;;  %v1443_v62 = vpop.f32.mrf.mxu0  ;;  %v1699_v11 = vpop.f32.mrf.mxu1 }
 0x1e5   : > { %v2240_v63 = vmax.f32 %v2208_v1, %v2110_v31  ;;  %v2049_v40 = vmax.f32 %v1921_v39, 0.0  ;;  %v1787_v52 = vmul.f32 %v3925_v53, %v1443_v62  ;;  %v1851_v14 = vmul.f32 %v3925_v53, %v1699_v11 }
 0x1e6   : > { %v2347_v37 = vsel %vm1170_vm1, %v2345_v50, %v2346_v3  ;;  %v2113_v12 = vmax.f32 %v1985_v13, 0.0  ;;  %v1445_v7 = vpop.f32.mrf.mxu0  ;;  %v1701_v4 = vpop.f32.mrf.mxu1 }
 0x1e7   : > { %v2431_v23 = vmax.f32 %v2271_v57, %v2347_v37  ;;  %v2348_v5 = vrot.slane %v2240_v63, 7  ;;  %v1922_v38 = vadd.f32 %v3936_v22, %v1787_v52  ;;  %v1986_v20 = vadd.f32 %v3936_v22, %v1851_v14 }
 0x1e8   : > { %v2209_v28 = vmax.f32 %v2049_v40, %v2113_v12  ;;  %v1446_v31 = vpop.f32.mrf.mxu0  ;;  %v1702_v2 = vpop.f32.mrf.mxu1  ;;  %v2272_v10 = vmax.f32 %v3852_v19, %v2240_v63 }
 0x1e9   : > { %v3016_v33 = vpack.c.bf16 %v2431_v23, %v2430_v46  ;;  %v2050_v34 = vmax.f32 %v1922_v38, 0.0  ;;  %v1788_v47 = vmul.f32 %v3925_v53, %v1446_v31  ;;  %v2114_v17 = vmax.f32 %v1986_v20, 0.0 }
 0x1ea   : > { %v2241_v30 = vmax.f32 %v2209_v28, %v2111_v24  ;;  %v1852_v0 = vmul.f32 %v3925_v53, %v1702_v2  ;;  %v1448_v54 = vpop.f32.mrf.mxu0  ;;  %v1704_v35 = vpop.f32.mrf.mxu1  ;;  %v2404_v15 = vsel %vm1170_vm1, 0.0, %v2348_v5 }
 0x1eb   : > { %3048 = vst [vmem:[%s3928_s23 + $0x58] sm:$0xff] %v3016_v33   ;;  %v1923_v26 = vadd.f32 %v3936_v22, %v1788_v47  ;;  %v2210_v25 = vmax.f32 %v2050_v34, %v2114_v17  ;;  %v2432_v42 = vmax.f32 %v2272_v10, %v2404_v15 }
 0x1ec   : > { %v2273_v60 = vmax.f32 %v3858_v43, %v2241_v30  ;;  %v2349_v51 = vrot.slane %v2241_v30, 7  ;;  %v1987_v29 = vadd.f32 %v3936_v22, %v1852_v0  ;;  %v1451_v45 = vpop.f32.mrf.mxu0  ;;  %v1707_v24 = vpop.f32.mrf.mxu1 }
 0x1ed   : > { %v2051_v50 = vmax.f32 %v1923_v26, 0.0  ;;  %v1789_v8 = vmul.f32 %v3925_v53, %v1451_v45  ;;  %v1853_v58 = vmul.f32 %v3925_v53, %v1707_v24  ;;  %v2242_v19 = vmax.f32 %v2210_v25, %v2112_v55 }
 0x1ee   : > { %v2350_v27 = vsel %vm1170_vm1, %v2348_v5, %v2349_v51  ;;  %v2115_v6 = vmax.f32 %v1987_v29, 0.0  ;;  %v1453_v56 = vpop.f32.mrf.mxu0  ;;  %v1709_v61 = vpop.f32.mrf.mxu1 }
 0x1ef   : > { %v2433_v43 = vmax.f32 %v2273_v60, %v2350_v27  ;;  %v1924_v21 = vadd.f32 %v3936_v22, %v1789_v8  ;;  %v1988_v41 = vadd.f32 %v3936_v22, %v1853_v58  ;;  %v2351_v36 = vrot.slane %v2242_v19, 7 }
 0x1f0   : > { %v2211_v49 = vmax.f32 %v2051_v50, %v2115_v6  ;;  %v1454_v1 = vpop.f32.mrf.mxu0  ;;  %v1710_v39 = vpop.f32.mrf.mxu1  ;;  %v2274_v40 = vmax.f32 %v3866_v59, %v2242_v19 }
 0x1f1   : > { %v3021_v16 = vpack.c.bf16 %v2433_v43, %v2432_v42  ;;  %v2052_v57 = vmax.f32 %v1924_v21, 0.0  ;;  %v2116_v3 = vmax.f32 %v1988_v41, 0.0  ;;  %v1790_v13 = vmul.f32 %v3925_v53, %v1454_v1 }
 0x1f2   : > { %v2243_v55 = vmax.f32 %v2211_v49, %v2113_v12  ;;  %v1854_v62 = vmul.f32 %v3925_v53, %v1710_v39  ;;  %v1456_v11 = vpop.f32.mrf.mxu0  ;;  %v1712_v63 = vpop.f32.mrf.mxu1  ;;  %v2405_v37 = vsel %vm1170_vm1, 0.0, %v2351_v36 }
 0x1f3   : > { %3049 = vst [vmem:[%s3928_s23 + $0x60] sm:$0xff] %v3021_v16   ;;  %v2212_v52 = vmax.f32 %v2052_v57, %v2116_v3  ;;  %v1925_v14 = vadd.f32 %v3936_v22, %v1790_v13  ;;  %v2434_v34 = vmax.f32 %v2274_v40, %v2405_v37 }
 0x1f4   : > { %v2275_v7 = vmax.f32 %v3870_v18, %v2243_v55  ;;  %v2352_v4 = vrot.slane %v2243_v55, 7  ;;  %v1989_v46 = vadd.f32 %v3936_v22, %v1854_v62  ;;  %v1459_v23 = vpop.f32.mrf.mxu0  ;;  %v1715_v5 = vpop.f32.mrf.mxu1 }
 0x1f5   : > { %v2244_v12 = vmax.f32 %v2212_v52, %v2114_v17  ;;  %v2053_v38 = vmax.f32 %v1925_v14, 0.0  ;;  %v1791_v28 = vmul.f32 %v3925_v53, %v1459_v23  ;;  %v1855_v20 = vmul.f32 %v3925_v53, %v1715_v5 }
 0x1f6   : > { %v2353_v59 = vsel %vm1170_vm1, %v2351_v36, %v2352_v4  ;;  %v2117_v31 = vmax.f32 %v1989_v46, 0.0  ;;  %v1461_v2 = vpop.f32.mrf.mxu0  ;;  %v1717_v33 = vpop.f32.mrf.mxu1 }
 0x1f7   : > { %v2435_v47 = vmax.f32 %v2275_v7, %v2353_v59  ;;  %v2354_v18 = vrot.slane %v2244_v12, 7  ;;  %v1926_v30 = vadd.f32 %v3936_v22, %v1791_v28  ;;  %v1990_v54 = vadd.f32 %v3936_v22, %v1855_v20 }
 0x1f8   : > { %v2213_v0 = vmax.f32 %v2053_v38, %v2117_v31  ;;  %v1462_v17 = vpop.f32.mrf.mxu0  ;;  %v1718_v35 = vpop.f32.mrf.mxu1  ;;  %v2276_v24 = vmax.f32 %v3876_v44, %v2244_v12 }
 0x1f9   : > { %v3026_v10 = vpack.c.bf16 %v2435_v47, %v2434_v34  ;;  %v2054_v15 = vmax.f32 %v1926_v30, 0.0  ;;  %v1792_v26 = vmul.f32 %v3925_v53, %v1462_v17  ;;  %v2118_v51 = vmax.f32 %v1990_v54, 0.0 }
 0x1fa   : > { %v2245_v60 = vmax.f32 %v2213_v0, %v2115_v6  ;;  %v1856_v25 = vmul.f32 %v3925_v53, %v1718_v35  ;;  %v1464_v29 = vpop.f32.mrf.mxu0  ;;  %v1720_v45 = vpop.f32.mrf.mxu1  ;;  %v2406_v50 = vsel %vm1170_vm1, 0.0, %v2354_v18 }
 0x1fb   : > { %3050 = vst [vmem:[%s3928_s23 + $0x68] sm:$0xff] %v3026_v10   ;;  %v1927_v8 = vadd.f32 %v3936_v22, %v1792_v26  ;;  %v2214_v19 = vmax.f32 %v2054_v15, %v2118_v51  ;;  %v2436_v43 = vmax.f32 %v2276_v24, %v2406_v50 }
 0x1fc   : > { %v2277_v58 = vmax.f32 %v3884_v9, %v2245_v60  ;;  %v2355_v27 = vrot.slane %v2245_v60, 7  ;;  %v1991_v56 = vadd.f32 %v3936_v22, %v1856_v25 }
 0x1fd   : > { %v2055_v6 = vmax.f32 %v1927_v8, 0.0  ;;  %v2246_v61 = vmax.f32 %v2214_v19, %v2116_v3 }
 0x1fe   : > { %v2356_v53 = vsel %vm1170_vm1, %v2354_v18, %v2355_v27  ;;  %v2119_v42 = vmax.f32 %v1991_v56, 0.0 }
 0x1ff   : > { %v2437_v44 = vmax.f32 %v2277_v58, %v2356_v53  ;;  %v2357_v21 = vrot.slane %v2246_v61, 7  ;;  %v2278_v9 = vmax.f32 %v3888_v32, %v2246_v61 }
 0x200   : > { %v2215_v41 = vmax.f32 %v2055_v6, %v2119_v42 }
 0x201   : > { %v3031_v36 = vpack.c.bf16 %v2437_v44, %v2436_v43  ;;  %v2407_v22 = vsel %vm1170_vm1, 0.0, %v2357_v21 }
 0x202   : > { %v2247_v49 = vmax.f32 %v2215_v41, %v2117_v31  ;;  %v2438_v57 = vmax.f32 %v2278_v9, %v2407_v22 }
 0x203   : > { %3051 = vst [vmem:[%s3928_s23 + $0x70] sm:$0xff] %v3031_v36  }
 0x204   : > { %v2279_v1 = vmax.f32 %v3894_v48, %v2247_v49  ;;  %v2358_v39 = vrot.slane %v2247_v49, 7 }
 0x206   : > { %v2359_v16 = vsel %vm1170_vm1, %v2357_v21, %v2358_v39 }
 0x207   : > { %v2439_v3 = vmax.f32 %v2279_v1, %v2359_v16 }
 0x209   : > { %v3036_v32 = vpack.c.bf16 %v2439_v3, %v2438_v57 }
 0x20b   : > { %3052 = vst [vmem:[%s3928_s23 + $0x78] sm:$0xff] %v3036_v32  }
 0x20c   : > { %3333 = shalt.err (!%p3330_p3)
}
 0x20d   : > { %s3334_s12 = scalar_lea.hbm %s4122_s7, 2048  ;;  %s3338_s20 = scalar_lea.hbm %s4173_s4, 4096 }
 0x20e   : > { %p3335_p4 = scmp.ne.s32.totalorder %s4122_s7, %s3334_s12  ;;  %p3339_p9 = scmp.lt.s32.totalorder %s4122_s7, %s4173_s4 }
 0x20f   : > { %p3340_p10 = scmp.lt.s32.totalorder %s3338_s20, %s3334_s12 }
 0x210   : > { %p3336_p7 = pnand %p3335_p4, %p3450_p5 }
 0x211   : > { %p3341_p11 = por %p3340_p10, %p3339_p9 }
 0x212   : > { %p3337_p8 = pneg %p3336_p7 }
 0x214   : > { %p3342_p12 = pnand %p3341_p11, %p3337_p8 }
 0x216   : > { %3345 = shalt.err (!%p3342_p12)
}
 0x217   : > { %s3385_s27 = smov 64   ;;  %s3386_s28 = smov 4  }
 0x218   : > { %3073 = dma.vmem_to_hbm [thread:$0]  (%p3450_p5), %s4124_s30, 2048, %s4122_s7, %s4129_s8, %s3385_s27, %s3385_s27, %s3386_s28  }
 0x219 PF: > { %p3079_p13 = scmp.ge.s32.totalorder %s3380_s18, 2  ;;  %s2629_s29 = sand.u32 1, %s3368_s15  }
 0x21a   : > { %s2630_s5 = scalar_lea.sflag [#allocation3], %s2629_s29 }
 0x21b   : > { %p3076_p0 = pnand %p3079_p13, %p3454_p6 }
 0x21d   : > { %p3077_p1 = pneg %p3076_p0 }
 0x21f   : > { %3363 = dma.done.wait (%p3077_p1), %s2630_s5, 2048  }
 0x220   : > { %3365 = vsyncadd (%p3077_p1), %s2630_s5, 4294965248  ;;  %p14_p2 = scmp.ge.s32.totalorder %s3437_s21, 4   ;;  %s4176_s15 = smov %s3372_s16 }
 0x221   : > { %s4177_s16 = smov %s3376_s17  ;;  %s4178_s17 = smov %s3448_s24 }
 0x222   : > { %s4179_s18 = smov %s3437_s21  ;;  %16 = sbr.rel (!%p14_p2) target bundleno = 3 (0x3), region = 71 }
 0x227   :  { %2635 = vsyncpa [#allocation3], 1 }
 0x228   :  { %2637 = vsyncpa [#allocation3 + $0x1], 1 }

</bundles_post_ra>
